<compile_context>
chip_gen: v5e
topology: v5e:2x2
jax: 0.10.0
libtpu: 0.0.40
codegen_flags: <defaults>
</compile_context>

<pallas_src>
import jax
import jax.numpy as jnp
from jax.experimental import pallas as pl
from jax.experimental.pallas import tpu as pltpu

SELU_ALPHA = 1.6732632423543772848170429916717
SELU_SCALE = 1.0507009873554804934193349852946


def _matmul_selu_kernel(w_ref, a_ref, o_ref):
    """o = selu(W @ A) for one M tile.  W: (Cout, K) bf16, A: (K, tm) bf16."""
    acc = jnp.dot(w_ref[...], a_ref[...], preferred_element_type=jnp.float32)
    # exp only sees non-positive values -> no inf in the untaken branch.
    neg = SELU_ALPHA * (jnp.exp(jnp.minimum(acc, 0.0)) - 1.0)
    o_ref[...] = (SELU_SCALE * jnp.where(acc > 0.0, acc, neg)).astype(o_ref.dtype)


def _choose_tm(m):
    """Lane-dense M tile: multiple of 128, <=1024, >=2 grid steps when possible."""
    if m <= 256:
        return m                      # single full block (still lane-dense / full-dim)
    tm = (m // 2) // 128 * 128        # aim for at least 2 grid steps (v7x megacore)
    return max(128, min(1024, tm))    # clamp so blocks always fit VMEM


def pallas_conv_matmul_selu(w_t, a_t):
    """selu(w_t @ a_t): w_t (Cout, K) bf16, a_t (K, M) bf16 -> (Cout, M) bf16."""
    cout, k = w_t.shape
    k2, m = a_t.shape
    assert k == k2
    tm = _choose_tm(m)
    grid = (pl.cdiv(m, tm),)
    return pl.pallas_call(
        _matmul_selu_kernel,
        out_shape=jax.ShapeDtypeStruct((cout, m), jnp.bfloat16),
        grid=grid,
        in_specs=[
            pl.BlockSpec((cout, k), lambda i: (0, 0)),   # weights resident in VMEM
            pl.BlockSpec((k, tm), lambda i: (0, i)),     # one lane-dense M tile
        ],
        out_specs=pl.BlockSpec((cout, tm), lambda i: (0, i)),
        compiler_params=pltpu.CompilerParams(
            dimension_semantics=("parallel",)),
    )(w_t, a_t)


def _im2col_T(x_cnhw, k, stride, pad):
    """(C, N, H, W) -> A_T of shape (K, M); K rows ordered (kh, kw, c), M = (n, oh, ow)."""
    if pad:
        x_cnhw = jnp.pad(x_cnhw, ((0, 0), (0, 0), (pad, pad), (pad, pad)))
    c, n, h, w = x_cnhw.shape
    oh = (h - k) // stride + 1
    ow = (w - k) // stride + 1
    taps = []
    for i in range(k):
        for j in range(k):
            taps.append(
                x_cnhw[:, :, i : i + stride * oh : stride, j : j + stride * ow : stride]
            )
    a_t = jnp.concatenate(taps, axis=0)            # (k*k*c, n, oh, ow)
    return a_t.reshape(k * k * c, n * oh * ow), (n, oh, ow)


def conv_selu(y_cnhw, w_t, k, stride, pad):
    """PyTorch-semantics Conv2d (no bias) + fused SELU via im2col + Pallas matmul."""
    a_t, (n, oh, ow) = _im2col_T(y_cnhw, k, stride, pad)
    z = pallas_conv_matmul_selu(w_t, a_t)          # (Cout, n*oh*ow) bf16
    return z.reshape(w_t.shape[0], n, oh, ow)


def d_stage1_forward(x_nchw, prepared):
    """Forward pass of D_Stage1.  x_nchw: (N, nc, H, W) float32."""
    conv_wts, w5_t = prepared
    y = jnp.transpose(x_nchw, (1, 0, 2, 3)).astype(jnp.bfloat16)   # (C, N, H, W)
    for w_t in conv_wts:                           # 4x convBlock(k=4, s=2, p=1) + SELU
        y = conv_selu(y, w_t, k=4, stride=2, pad=1)
    # Final Conv2d(8*ndf -> 1, k=4, s=1, p=0) + Sigmoid: tiny, plain XLA per review.
    a5, (n, oh, ow) = _im2col_T(y, 4, 1, 0)        # (8*ndf*16, n*oh*ow)
    logits = jnp.dot(w5_t, a5.astype(jnp.float32)) # (1, n*oh*ow)
    out = jax.nn.sigmoid(logits).reshape(1, n, oh, ow)
    # PyTorch .squeeze(): drop all singleton dims -> (N,) for the 64x64 case.
    return jnp.squeeze(out)


def init_params(key, nc=3, ndf=8):
    """Deterministic synthetic Conv2d weights (OIHW, no bias), DCGAN-style init."""
    shapes = [
        (ndf, nc, 4, 4),
        (2 * ndf, ndf, 4, 4),
        (4 * ndf, 2 * ndf, 4, 4),
        (8 * ndf, 4 * ndf, 4, 4),
        (1, 8 * ndf, 4, 4),
    ]
    keys = jax.random.split(key, len(shapes))
    return [0.02 * jax.random.normal(kk, s, dtype=jnp.float32)
            for kk, s in zip(keys, shapes)]


def prepare_params(params):
    """One-time weight transform: OIHW -> (O, KH*KW*I), rows ordered (kh, kw, c)."""
    def to_mat(w):
        o, i, kh, kw = w.shape
        return jnp.transpose(w, (0, 2, 3, 1)).reshape(o, kh * kw * i)
    conv_wts = [to_mat(w).astype(jnp.bfloat16) for w in params[:4]]
    w5_t = to_mat(params[4]).astype(jnp.float32)
    return conv_wts, w5_t


if __name__ == "__main__":
    # Spatial must be 64 so that four stride-2 convs give 4x4 and the final
    # 4x4 valid conv yields 1x1 (as in the reference DCGAN discriminator).
    batch, nc, ndf, hw = 2, 3, 8, 64

    root = jax.random.PRNGKey(0)
    k_x, k_p = jax.random.split(root)
    x = jax.random.normal(k_x, (batch, nc, hw, hw), dtype=jnp.float32)
    params = init_params(k_p, nc=nc, ndf=ndf)
    prepared = prepare_params(params)              # one-time, outside forward path

    fwd = jax.jit(d_stage1_forward)
    out = jax.block_until_ready(fwd(x, prepared))
    assert out.shape == (batch,), out.shape
    assert bool(jnp.all((out >= 0.0) & (out <= 1.0)))
    print("KERNEL_OK")
</pallas_src>

<mosaic_0001>
module attributes {stable_mosaic.version = 11 : i64} {
  func.func @_matmul_selu_kernel(%arg0: i32, %arg1: memref<8x48xbf16, #tpu.memory_space<vmem>>, %arg2: memref<48x1024xbf16, #tpu.memory_space<vmem>>, %arg3: memref<8x1024xbf16, #tpu.memory_space<vmem>>) attributes {dimension_semantics = [#tpu.dimension_semantics<parallel>], iteration_bounds = array<i64: 2>, scalar_prefetch = 0 : i64, scratch_operands = 0 : i64, tpu.core_type = #tpu.core_type<tc>, window_params = [{pipeline_mode = #tpu.pipeline_mode<synchronous>, transform_indices = @transform_0, window_bounds = array<i64: 8, 48>}, {transform_indices = @transform_1, window_bounds = array<i64: 48, 1024>}, {transform_indices = @transform_2, window_bounds = array<i64: 8, 1024>}]} {
    %c0 = arith.constant 0 : index
    %c0_0 = arith.constant 0 : index
    %0 = vector.load %arg1[%c0, %c0_0] : memref<8x48xbf16, #tpu.memory_space<vmem>>, vector<8x48xbf16>
    %c0_1 = arith.constant 0 : index
    %c0_2 = arith.constant 0 : index
    %1 = vector.load %arg2[%c0_1, %c0_2] : memref<48x1024xbf16, #tpu.memory_space<vmem>>, vector<48x1024xbf16>
    %cst = arith.constant dense<0.000000e+00> : vector<8x1024xf32>
    %2 = tpu.matmul %0, %1, %cst {dimension_numbers = #tpu.dot_dimension_numbers<[1], [0], [0], [1], [0, 0, 1, 1], [], []>} : vector<8x48xbf16>, vector<48x1024xbf16>, vector<8x1024xf32> -> vector<8x1024xf32>
    %cst_3 = arith.constant 0.000000e+00 : f32
    %3 = vector.broadcast %cst_3 : f32 to vector<8x1024xf32>
    %4 = arith.minimumf %2, %3 : vector<8x1024xf32>
    %5 = math.exp %4 : vector<8x1024xf32>
    %cst_4 = arith.constant 1.000000e+00 : f32
    %6 = vector.broadcast %cst_4 : f32 to vector<8x1024xf32>
    %7 = arith.subf %5, %6 : vector<8x1024xf32>
    %cst_5 = arith.constant 1.67326319 : f32
    %8 = vector.broadcast %cst_5 : f32 to vector<8x1024xf32>
    %9 = arith.mulf %8, %7 : vector<8x1024xf32>
    %cst_6 = arith.constant 0.000000e+00 : f32
    %10 = vector.broadcast %cst_6 : f32 to vector<8x1024xf32>
    %11 = arith.cmpf ogt, %2, %10 : vector<8x1024xf32>
    %12 = arith.select %11, %2, %9 : vector<8x1024xi1>, vector<8x1024xf32>
    %cst_7 = arith.constant 1.05070102 : f32
    %13 = vector.broadcast %cst_7 : f32 to vector<8x1024xf32>
    %14 = arith.mulf %13, %12 : vector<8x1024xf32>
    %15 = arith.truncf %14 : vector<8x1024xf32> to vector<8x1024xbf16>
    %c0_8 = arith.constant 0 : index
    %c0_9 = arith.constant 0 : index
    %16 = vector.load %arg3[%c0_8, %c0_9] : memref<8x1024xbf16, #tpu.memory_space<vmem>>, vector<8x1024xbf16>
    tpu.vector_store %arg3[%c0_8, %c0_9], %15 {strides = array<i32>} : memref<8x1024xbf16, #tpu.memory_space<vmem>>, vector<8x1024xbf16>,
    return
  }
  func.func @transform_0(%arg0: i32) -> (i32, i32) {
    %c0_i32 = arith.constant 0 : i32
    %c0_i32_0 = arith.constant 0 : i32
    %c0_i32_1 = arith.constant 0 : i32
    return %c0_i32, %c0_i32_0 : i32, i32
  }
  func.func @transform_1(%arg0: i32) -> (i32, i32) {
    %c0_i32 = arith.constant 0 : i32
    %c0_i32_0 = arith.constant 0 : i32
    return %c0_i32, %arg0 : i32, i32
  }
  func.func @transform_2(%arg0: i32) -> (i32, i32) {
    %c0_i32 = arith.constant 0 : i32
    %c0_i32_0 = arith.constant 0 : i32
    return %c0_i32, %arg0 : i32, i32
  }
}

module attributes {stable_mosaic.version = 11 : i64} {
  func.func @_matmul_selu_kernel(%arg0: i32, %arg1: memref<16x128xbf16, #tpu.memory_space<vmem>>, %arg2: memref<128x256xbf16, #tpu.memory_space<vmem>>, %arg3: memref<16x256xbf16, #tpu.memory_space<vmem>>) attributes {dimension_semantics = [#tpu.dimension_semantics<parallel>], iteration_bounds = array<i64: 2>, scalar_prefetch = 0 : i64, scratch_operands = 0 : i64, tpu.core_type = #tpu.core_type<tc>, window_params = [{pipeline_mode = #tpu.pipeline_mode<synchronous>, transform_indices = @transform_0, window_bounds = array<i64: 16, 128>}, {transform_indices = @transform_1, window_bounds = array<i64: 128, 256>}, {transform_indices = @transform_2, window_bounds = array<i64: 16, 256>}]} {
    %c0 = arith.constant 0 : index
    %c0_0 = arith.constant 0 : index
    %0 = vector.load %arg1[%c0, %c0_0] : memref<16x128xbf16, #tpu.memory_space<vmem>>, vector<16x128xbf16>
    %c0_1 = arith.constant 0 : index
    %c0_2 = arith.constant 0 : index
    %1 = vector.load %arg2[%c0_1, %c0_2] : memref<128x256xbf16, #tpu.memory_space<vmem>>, vector<128x256xbf16>
    %cst = arith.constant dense<0.000000e+00> : vector<16x256xf32>
    %2 = tpu.matmul %0, %1, %cst {dimension_numbers = #tpu.dot_dimension_numbers<[1], [0], [0], [1], [0, 0, 1, 1], [], []>} : vector<16x128xbf16>, vector<128x256xbf16>, vector<16x256xf32> -> vector<16x256xf32>
    %cst_3 = arith.constant 0.000000e+00 : f32
    %3 = vector.broadcast %cst_3 : f32 to vector<16x256xf32>
    %4 = arith.minimumf %2, %3 : vector<16x256xf32>
    %5 = math.exp %4 : vector<16x256xf32>
    %cst_4 = arith.constant 1.000000e+00 : f32
    %6 = vector.broadcast %cst_4 : f32 to vector<16x256xf32>
    %7 = arith.subf %5, %6 : vector<16x256xf32>
    %cst_5 = arith.constant 1.67326319 : f32
    %8 = vector.broadcast %cst_5 : f32 to vector<16x256xf32>
    %9 = arith.mulf %8, %7 : vector<16x256xf32>
    %cst_6 = arith.constant 0.000000e+00 : f32
    %10 = vector.broadcast %cst_6 : f32 to vector<16x256xf32>
    %11 = arith.cmpf ogt, %2, %10 : vector<16x256xf32>
    %12 = arith.select %11, %2, %9 : vector<16x256xi1>, vector<16x256xf32>
    %cst_7 = arith.constant 1.05070102 : f32
    %13 = vector.broadcast %cst_7 : f32 to vector<16x256xf32>
    %14 = arith.mulf %13, %12 : vector<16x256xf32>
    %15 = arith.truncf %14 : vector<16x256xf32> to vector<16x256xbf16>
    %c0_8 = arith.constant 0 : index
    %c0_9 = arith.constant 0 : index
    %16 = vector.load %arg3[%c0_8, %c0_9] : memref<16x256xbf16, #tpu.memory_space<vmem>>, vector<16x256xbf16>
    tpu.vector_store %arg3[%c0_8, %c0_9], %15 {strides = array<i32>} : memref<16x256xbf16, #tpu.memory_space<vmem>>, vector<16x256xbf16>,
    return
  }
  func.func @transform_0(%arg0: i32) -> (i32, i32) {
    %c0_i32 = arith.constant 0 : i32
    %c0_i32_0 = arith.constant 0 : i32
    %c0_i32_1 = arith.constant 0 : i32
    return %c0_i32, %c0_i32_0 : i32, i32
  }
  func.func @transform_1(%arg0: i32) -> (i32, i32) {
    %c0_i32 = arith.constant 0 : i32
    %c0_i32_0 = arith.constant 0 : i32
    return %c0_i32, %arg0 : i32, i32
  }
  func.func @transform_2(%arg0: i32) -> (i32, i32) {
    %c0_i32 = arith.constant 0 : i32
    %c0_i32_0 = arith.constant 0 : i32
    return %c0_i32, %arg0 : i32, i32
  }
}

module attributes {stable_mosaic.version = 11 : i64} {
  func.func @_matmul_selu_kernel(%arg0: i32, %arg1: memref<32x256xbf16, #tpu.memory_space<vmem>>, %arg2: memref<256x128xbf16, #tpu.memory_space<vmem>>, %arg3: memref<32x128xbf16, #tpu.memory_space<vmem>>) attributes {dimension_semantics = [#tpu.dimension_semantics<parallel>], iteration_bounds = array<i64: 1>, scalar_prefetch = 0 : i64, scratch_operands = 0 : i64, tpu.core_type = #tpu.core_type<tc>, window_params = [{pipeline_mode = #tpu.pipeline_mode<synchronous>, transform_indices = @transform_0, window_bounds = array<i64: 32, 256>}, {transform_indices = @transform_1, window_bounds = array<i64: 256, 128>}, {transform_indices = @transform_2, window_bounds = array<i64: 32, 128>}]} {
    %c0 = arith.constant 0 : index
    %c0_0 = arith.constant 0 : index
    %0 = vector.load %arg1[%c0, %c0_0] : memref<32x256xbf16, #tpu.memory_space<vmem>>, vector<32x256xbf16>
    %c0_1 = arith.constant 0 : index
    %c0_2 = arith.constant 0 : index
    %1 = vector.load %arg2[%c0_1, %c0_2] : memref<256x128xbf16, #tpu.memory_space<vmem>>, vector<256x128xbf16>
    %cst = arith.constant dense<0.000000e+00> : vector<32x128xf32>
    %2 = tpu.matmul %0, %1, %cst {dimension_numbers = #tpu.dot_dimension_numbers<[1], [0], [0], [1], [0, 0, 1, 1], [], []>} : vector<32x256xbf16>, vector<256x128xbf16>, vector<32x128xf32> -> vector<32x128xf32>
    %cst_3 = arith.constant 0.000000e+00 : f32
    %3 = vector.broadcast %cst_3 : f32 to vector<32x128xf32>
    %4 = arith.minimumf %2, %3 : vector<32x128xf32>
    %5 = math.exp %4 : vector<32x128xf32>
    %cst_4 = arith.constant 1.000000e+00 : f32
    %6 = vector.broadcast %cst_4 : f32 to vector<32x128xf32>
    %7 = arith.subf %5, %6 : vector<32x128xf32>
    %cst_5 = arith.constant 1.67326319 : f32
    %8 = vector.broadcast %cst_5 : f32 to vector<32x128xf32>
    %9 = arith.mulf %8, %7 : vector<32x128xf32>
    %cst_6 = arith.constant 0.000000e+00 : f32
    %10 = vector.broadcast %cst_6 : f32 to vector<32x128xf32>
    %11 = arith.cmpf ogt, %2, %10 : vector<32x128xf32>
    %12 = arith.select %11, %2, %9 : vector<32x128xi1>, vector<32x128xf32>
    %cst_7 = arith.constant 1.05070102 : f32
    %13 = vector.broadcast %cst_7 : f32 to vector<32x128xf32>
    %14 = arith.mulf %13, %12 : vector<32x128xf32>
    %15 = arith.truncf %14 : vector<32x128xf32> to vector<32x128xbf16>
    %c0_8 = arith.constant 0 : index
    %c0_9 = arith.constant 0 : index
    %16 = vector.load %arg3[%c0_8, %c0_9] : memref<32x128xbf16, #tpu.memory_space<vmem>>, vector<32x128xbf16>
    tpu.vector_store %arg3[%c0_8, %c0_9], %15 {strides = array<i32>} : memref<32x128xbf16, #tpu.memory_space<vmem>>, vector<32x128xbf16>,
    return
  }
  func.func @transform_0(%arg0: i32) -> (i32, i32) {
    %c0_i32 = arith.constant 0 : i32
    %c0_i32_0 = arith.constant 0 : i32
    %c0_i32_1 = arith.constant 0 : i32
    return %c0_i32, %c0_i32_0 : i32, i32
  }
  func.func @transform_1(%arg0: i32) -> (i32, i32) {
    %c0_i32 = arith.constant 0 : i32
    %c0_i32_0 = arith.constant 0 : i32
    return %c0_i32, %arg0 : i32, i32
  }
  func.func @transform_2(%arg0: i32) -> (i32, i32) {
    %c0_i32 = arith.constant 0 : i32
    %c0_i32_0 = arith.constant 0 : i32
    return %c0_i32, %arg0 : i32, i32
  }
}

module attributes {stable_mosaic.version = 11 : i64} {
  func.func @_matmul_selu_kernel(%arg0: i32, %arg1: memref<64x512xbf16, #tpu.memory_space<vmem>>, %arg2: memref<512x32xbf16, #tpu.memory_space<vmem>>, %arg3: memref<64x32xbf16, #tpu.memory_space<vmem>>) attributes {dimension_semantics = [#tpu.dimension_semantics<parallel>], iteration_bounds = array<i64: 1>, scalar_prefetch = 0 : i64, scratch_operands = 0 : i64, tpu.core_type = #tpu.core_type<tc>, window_params = [{pipeline_mode = #tpu.pipeline_mode<synchronous>, transform_indices = @transform_0, window_bounds = array<i64: 64, 512>}, {transform_indices = @transform_1, window_bounds = array<i64: 512, 32>}, {transform_indices = @transform_2, window_bounds = array<i64: 64, 32>}]} {
    %c0 = arith.constant 0 : index
    %c0_0 = arith.constant 0 : index
    %0 = vector.load %arg1[%c0, %c0_0] : memref<64x512xbf16, #tpu.memory_space<vmem>>, vector<64x512xbf16>
    %c0_1 = arith.constant 0 : index
    %c0_2 = arith.constant 0 : index
    %1 = vector.load %arg2[%c0_1, %c0_2] : memref<512x32xbf16, #tpu.memory_space<vmem>>, vector<512x32xbf16>
    %cst = arith.constant dense<0.000000e+00> : vector<64x32xf32>
    %2 = tpu.matmul %0, %1, %cst {dimension_numbers = #tpu.dot_dimension_numbers<[1], [0], [0], [1], [0, 0, 1, 1], [], []>} : vector<64x512xbf16>, vector<512x32xbf16>, vector<64x32xf32> -> vector<64x32xf32>
    %cst_3 = arith.constant 0.000000e+00 : f32
    %3 = vector.broadcast %cst_3 : f32 to vector<64x32xf32>
    %4 = arith.minimumf %2, %3 : vector<64x32xf32>
    %5 = math.exp %4 : vector<64x32xf32>
    %cst_4 = arith.constant 1.000000e+00 : f32
    %6 = vector.broadcast %cst_4 : f32 to vector<64x32xf32>
    %7 = arith.subf %5, %6 : vector<64x32xf32>
    %cst_5 = arith.constant 1.67326319 : f32
    %8 = vector.broadcast %cst_5 : f32 to vector<64x32xf32>
    %9 = arith.mulf %8, %7 : vector<64x32xf32>
    %cst_6 = arith.constant 0.000000e+00 : f32
    %10 = vector.broadcast %cst_6 : f32 to vector<64x32xf32>
    %11 = arith.cmpf ogt, %2, %10 : vector<64x32xf32>
    %12 = arith.select %11, %2, %9 : vector<64x32xi1>, vector<64x32xf32>
    %cst_7 = arith.constant 1.05070102 : f32
    %13 = vector.broadcast %cst_7 : f32 to vector<64x32xf32>
    %14 = arith.mulf %13, %12 : vector<64x32xf32>
    %15 = arith.truncf %14 : vector<64x32xf32> to vector<64x32xbf16>
    %c0_8 = arith.constant 0 : index
    %c0_9 = arith.constant 0 : index
    %16 = vector.load %arg3[%c0_8, %c0_9] : memref<64x32xbf16, #tpu.memory_space<vmem>>, vector<64x32xbf16>
    tpu.vector_store %arg3[%c0_8, %c0_9], %15 {strides = array<i32>} : memref<64x32xbf16, #tpu.memory_space<vmem>>, vector<64x32xbf16>,
    return
  }
  func.func @transform_0(%arg0: i32) -> (i32, i32) {
    %c0_i32 = arith.constant 0 : i32
    %c0_i32_0 = arith.constant 0 : i32
    %c0_i32_1 = arith.constant 0 : i32
    return %c0_i32, %c0_i32_0 : i32, i32
  }
  func.func @transform_1(%arg0: i32) -> (i32, i32) {
    %c0_i32 = arith.constant 0 : i32
    %c0_i32_0 = arith.constant 0 : i32
    return %c0_i32, %arg0 : i32, i32
  }
  func.func @transform_2(%arg0: i32) -> (i32, i32) {
    %c0_i32 = arith.constant 0 : i32
    %c0_i32_0 = arith.constant 0 : i32
    return %c0_i32, %arg0 : i32, i32
  }
}

</mosaic_0001>

<bundles_post_ra>
// kernel: d_stage1_forward.4
= control target key start
LH: loop header
LB: loop body
LE: loop exit
PB: predicated region body
PF: predicated region fallthrough
CT: control target
= control target key end

     0   :  { %s829_s9 = smov 0   ;;  %s831_s10 = smov 0   ;;  %s1000_s0 = inlined_call_operand.vmem [shape: bf16[8,48], index: 0, kind: input, shape index: {}]   ;;  %s1001_s1 = inlined_call_operand.vmem [shape: bf16[48,2048], index: 1, kind: input, shape index: {}]   ;;  %s1002_s2 = inlined_call_operand.vmem [shape: bf16[8,2048], index: 2, kind: output, shape index: {}]  }
   0x1   :  { %s833_s11 = smov 0  }
   0x2 LB: > { %s600_s12 = sadd.s32 4294967295, %s812_s11   ;;  %s846_s13 = sadd.s32 1, %s812_s11   ;;  %s812_s11 = sphi %s833_s11, %s1005_s11   ;;  %s808_s10 = sphi %s831_s10, %s1004_s10   ;;  %s804_s9 = sphi %s829_s9, %s1003_s9  }
   0x3   : > { %s37_s14 = ssub.s32 %s812_s11, %s846_s13  ;;  %s40_s15 = sadd.s32 1, %s808_s10 }
   0x4   : > { %p38_p0 = scmp.eq.s32.totalorder %s37_s14, 0  ;;  %p47_p1 = scmp.ne.s32.totalorder %s808_s10, %s804_s9 }
   0x5   : > { %p48_p2 = scmp.eq.s32.totalorder %s812_s11, 0  ;;  %p603_p4 = scmp.ge.s32.totalorder %s812_s11, 2 }
   0x6   : > { %s855_s16 = scalar_select %p38_p0, %s808_s10, %s40_s15  }
   0x7   : > { %p49_p3 = por %p48_p2, %p47_p1  ;;  %102 = sbr.rel (%p603_p4) target bundleno = 40 (0x28), region = 20 }
   0xc   : > { %105 = sbr.rel (!%p49_p3) target bundleno = 40 (0x28), region = 24  ;;  %s107_s17 = sand.u32 (%p49_p3), 1, %s808_s10  }
   0xd   : > { %s723_s18 = sshll.u32 (%p49_p3), %s812_s11, 5  ;;  %s748_s19 = smul.u32 (%p49_p3), 192, %s107_s17 }
   0xe   : > { %s863_s22 = scalar_lea.vmem (%p49_p3), %s1001_s1, %s723_s18 }
   0xf   : > { %v125_v0 = vld [vmem:[%s863_s22] sm:$0xff] (%p49_p3)  ;;  %v127_v1 = vld [vmem:[%s863_s22 + $0x8] sm:$0xff] (%p49_p3)  ;;  %v129_v2 = vld [vmem:[%s863_s22 + $0x10] sm:$0xff] (%p49_p3)  ;;  %s868_s23 = scalar_lea.vmem (%p49_p3), [#allocation2], %s748_s19 }
  0x10   : > { %126 = vst [vmem:[%s868_s23] sm:$0xff] (%p49_p3), %v125_v0  ;;  %v131_v3 = vld [vmem:[%s863_s22 + $0x18] sm:$0xff] (%p49_p3)  ;;  %v133_v4 = vld [vmem:[%s863_s22 + $0x40] sm:$0xff] (%p49_p3)  ;;  %v135_v5 = vld [vmem:[%s863_s22 + $0x48] sm:$0xff] (%p49_p3) }
  0x11   : > { %128 = vst [vmem:[%s868_s23 + $0x8] sm:$0xff] %v127_v1  ;;  %v137_v6 = vld [vmem:[%s863_s22 + $0x50] sm:$0xff]  ;;  %v139_v7 = vld [vmem:[%s863_s22 + $0x58] sm:$0xff]  ;;  %v141_v8 = vld [vmem:[%s863_s22 + $0x80] sm:$0xff] }
  0x12   : > { %130 = vst [vmem:[%s868_s23 + $0x10] sm:$0xff] %v129_v2  ;;  %v143_v9 = vld [vmem:[%s863_s22 + $0x88] sm:$0xff]  ;;  %v145_v10 = vld [vmem:[%s863_s22 + $0x90] sm:$0xff]  ;;  %v147_v11 = vld [vmem:[%s863_s22 + $0x98] sm:$0xff] }
  0x13   : > { %132 = vst [vmem:[%s868_s23 + $0x18] sm:$0xff] %v131_v3  ;;  %v149_v12 = vld [vmem:[%s863_s22 + $0xc0] sm:$0xff]  ;;  %v151_v13 = vld [vmem:[%s863_s22 + $0xc8] sm:$0xff]  ;;  %v153_v14 = vld [vmem:[%s863_s22 + $0xd0] sm:$0xff] }
  0x14   : > { %134 = vst [vmem:[%s868_s23 + $0x20] sm:$0xff] %v133_v4  ;;  %v155_v15 = vld [vmem:[%s863_s22 + $0xd8] sm:$0xff]  ;;  %v157_v16 = vld [vmem:[%s863_s22 + $0x100] sm:$0xff]  ;;  %v159_v17 = vld [vmem:[%s863_s22 + $0x108] sm:$0xff] }
  0x15   : > { %136 = vst [vmem:[%s868_s23 + $0x28] sm:$0xff] %v135_v5  ;;  %v161_v18 = vld [vmem:[%s863_s22 + $0x110] sm:$0xff]  ;;  %v163_v19 = vld [vmem:[%s863_s22 + $0x118] sm:$0xff]  ;;  %v165_v20 = vld [vmem:[%s863_s22 + $0x140] sm:$0xff] }
  0x16   : > { %138 = vst [vmem:[%s868_s23 + $0x30] sm:$0xff] %v137_v6  ;;  %v167_v21 = vld [vmem:[%s863_s22 + $0x148] sm:$0xff]  ;;  %v169_v22 = vld [vmem:[%s863_s22 + $0x150] sm:$0xff]  ;;  %v171_v23 = vld [vmem:[%s863_s22 + $0x158] sm:$0xff] }
  0x17   : > { %140 = vst [vmem:[%s868_s23 + $0x38] sm:$0xff] %v139_v7 }
  0x18   : > { %142 = vst [vmem:[%s868_s23 + $0x40] sm:$0xff] %v141_v8 }
  0x19   : > { %144 = vst [vmem:[%s868_s23 + $0x48] sm:$0xff] %v143_v9 }
  0x1a   : > { %146 = vst [vmem:[%s868_s23 + $0x50] sm:$0xff] %v145_v10 }
  0x1b   : > { %148 = vst [vmem:[%s868_s23 + $0x58] sm:$0xff] %v147_v11 }
  0x1c   : > { %150 = vst [vmem:[%s868_s23 + $0x60] sm:$0xff] %v149_v12 }
  0x1d   : > { %152 = vst [vmem:[%s868_s23 + $0x68] sm:$0xff] %v151_v13 }
  0x1e   : > { %154 = vst [vmem:[%s868_s23 + $0x70] sm:$0xff] %v153_v14 }
  0x1f   : > { %156 = vst [vmem:[%s868_s23 + $0x78] sm:$0xff] %v155_v15 }
  0x20   : > { %158 = vst [vmem:[%s868_s23 + $0x80] sm:$0xff] %v157_v16 }
  0x21   : > { %160 = vst [vmem:[%s868_s23 + $0x88] sm:$0xff] %v159_v17 }
  0x22   : > { %162 = vst [vmem:[%s868_s23 + $0x90] sm:$0xff] %v161_v18 }
  0x23   : > { %164 = vst [vmem:[%s868_s23 + $0x98] sm:$0xff] %v163_v19 }
  0x24   : > { %166 = vst [vmem:[%s868_s23 + $0xa0] sm:$0xff] %v165_v20 }
  0x25   : > { %168 = vst [vmem:[%s868_s23 + $0xa8] sm:$0xff] %v167_v21 }
  0x26   : > { %170 = vst [vmem:[%s868_s23 + $0xb0] sm:$0xff] %v169_v22 }
  0x27   : > { %172 = vst [vmem:[%s868_s23 + $0xb8] sm:$0xff] %v171_v23 }
  0x28 PF: > { %p606_p5 = scmp.ge.s32.totalorder %s812_s11, 1  ;;  %p177_p6 = scmp.lt.s32.totalorder %s812_s11, 3 }
  0x2a   : > { %p178_p7 = pnand %p606_p5, %p177_p6 }
  0x2b   : > { %s184_s24 = sand.u32 (!%p178_p7), 1, %s804_s9   ;;  %s607_s29 = sshll.u32 (!%p178_p7), %s600_s12, 3 }
  0x2c   : > { %181 = sbr.rel (%p178_p7) target bundleno = 235 (0xeb), region = 47  ;;  %p207_p8 = scmp.lt.s32.totalorder (!%p178_p7), %s607_s29, 15 }
  0x2d   : > { %s749_s25 = smul.u32 (!%p178_p7), 192, %s184_s24 }
  0x2f   : > { %s918_s26 = scalar_lea.vmem (!%p178_p7), [#allocation2], %s749_s25 }
  0x31   : > { %v675_v24 = vld [vmem:[%s918_s26 + $0x80] sm:$0xf]  ;;  %v740_v26 = vld [vmem:[%s918_s26 + $0x84] sm:$0xf]  ;;  %v683_v29 = vld [vmem:[%s918_s26 + $0x88] sm:$0xf] }
  0x32   : > { %v744_v25 = vld [vmem:[%s918_s26 + $0x9c] sm:$0xf0]  ;;  %v677_v28 = vld [vmem:[%s918_s26 + $0xa0] sm:$0xf0]  ;;  %v745_v30 = vld [vmem:[%s918_s26 + $0xa4] sm:$0xf0] }
  0x33   : > { %v676_v27 = vor.u32 %v744_v25, %v675_v24  ;;  %v680_v31 = vor.u32 %v740_v26, %v677_v28  ;;  %v684_v32 = vor.u32 %v745_v30, %v683_v29  ;;  %v741_v33 = vld [vmem:[%s918_s26 + $0x8c] sm:$0xf]  ;;  %v643_v35 = vld [vmem:[%s918_s26 + $0x40] sm:$0xf]  ;;  %v732_v38 = vld [vmem:[%s918_s26 + $0x44] sm:$0xf] }
  0x34   : > { %v685_v34 = vld [vmem:[%s918_s26 + $0xa8] sm:$0xf0]  ;;  %v736_v37 = vld [vmem:[%s918_s26 + $0x5c] sm:$0xf0]  ;;  %v645_v39 = vld [vmem:[%s918_s26 + $0x60] sm:$0xf0] }
  0x35   : > { %367 = vmatpush.bf16.msra.mxu0 %v676_v27  ;;  %v688_v36 = vor.u32 %v741_v33, %v685_v34  ;;  %vm358_vm0 = vcmask 392192   ;;  %380 = vmatpush.bf16.msra.mxu1 %v680_v31  ;;  %v644_v40 = vor.u32 %v736_v37, %v643_v35  ;;  %v648_v41 = vor.u32 %v732_v38, %v645_v39  ;;  %v651_v42 = vld [vmem:[%s918_s26 + $0x48] sm:$0xf]  ;;  %v733_v44 = vld [vmem:[%s918_s26 + $0x4c] sm:$0xf]  ;;  %s1007_s29 = smov (!%p207_p8, %s607_s29), 15 }
  0x36   : > { %393 = vmatpush.bf16.msra.mxu2 %v684_v32  ;;  %v737_v43 = vld [vmem:[%s918_s26 + $0x64] sm:$0xf0]  ;;  %v653_v46 = vld [vmem:[%s918_s26 + $0x68] sm:$0xf0]  ;;  %v611_v47 = vld [vmem:[%s918_s26] sm:$0xf] }
  0x37   : > { %406 = vmatpush.bf16.msra.mxu3 %v688_v36  ;;  %v652_v45 = vor.u32 %v737_v43, %v651_v42  ;;  %v728_v48 = vld [vmem:[%s918_s26 + $0x1c] sm:$0xf0]  ;;  %v656_v49 = vor.u32 %v733_v44, %v653_v46  ;;  %v724_v50 = vld [vmem:[%s918_s26 + $0x4] sm:$0xf]  ;;  %v619_v52 = vld [vmem:[%s918_s26 + $0x8] sm:$0xf] }
  0x38   : > { %v613_v51 = vld [vmem:[%s918_s26 + $0x20] sm:$0xf0]  ;;  %v612_v53 = vor.u32 %v728_v48, %v611_v47  ;;  %v729_v54 = vld [vmem:[%s918_s26 + $0x24] sm:$0xf0]  ;;  %v725_v55 = vld [vmem:[%s918_s26 + $0xc] sm:$0xf] }
  0x39   : > { %368 = vmatpush.bf16.msra.mxu0 %v644_v40  ;;  %v621_v56 = vld [vmem:[%s918_s26 + $0x28] sm:$0xf0]  ;;  %381 = vmatpush.bf16.msra.mxu1 %v648_v41  ;;  %v616_v57 = vor.u32 %v724_v50, %v613_v51  ;;  %v620_v58 = vor.u32 %v729_v54, %v619_v52  ;;  %v699_v59 = vld [vmem:[%s918_s26 + $0x98] sm:$0xf]  ;;  %v743_v61 = vld [vmem:[%s918_s26 + $0x9c] sm:$0xf] }
  0x3a   : > { %394 = vmatpush.bf16.msra.mxu2 %v652_v45  ;;  %v747_v60 = vld [vmem:[%s918_s26 + $0xb4] sm:$0xf0]  ;;  %v624_v62 = vor.u32 %v725_v55, %v621_v56  ;;  %v213_v63 = vld [vmem:[%s1000_s0] sm:$0xf]  ;;  %v701_v1 = vld [vmem:[%s918_s26 + $0xb8] sm:$0xf0] }
  0x3b   : > { %407 = vmatpush.bf16.msra.mxu3 %v656_v49  ;;  %v700_v0 = vor.u32 %v747_v60, %v699_v59  ;;  %v691_v2 = vld [vmem:[%s918_s26 + $0x90] sm:$0xf]  ;;  %v704_v4 = vor.u32 %v743_v61, %v701_v1  ;;  %v742_v5 = vld [vmem:[%s918_s26 + $0x94] sm:$0xf]  ;;  %v667_v7 = vld [vmem:[%s918_s26 + $0x58] sm:$0xf] }
  0x3c   : > { %v746_v3 = vld [vmem:[%s918_s26 + $0xac] sm:$0xf0]  ;;  %v693_v6 = vld [vmem:[%s918_s26 + $0xb0] sm:$0xf0]  ;;  %v739_v8 = vld [vmem:[%s918_s26 + $0x74] sm:$0xf0] }
  0x3d   : > { %369 = vmatpush.bf16.msra.mxu0 %v612_v53  ;;  %v735_v9 = vld [vmem:[%s918_s26 + $0x5c] sm:$0xf]  ;;  %382 = vmatpush.bf16.msra.mxu1 %v616_v57  ;;  %v692_v11 = vor.u32 %v746_v3, %v691_v2  ;;  %v696_v12 = vor.u32 %v742_v5, %v693_v6  ;;  %v668_v13 = vor.u32 %v739_v8, %v667_v7  ;;  %v659_v14 = vld [vmem:[%s918_s26 + $0x50] sm:$0xf]  ;;  %v734_v16 = vld [vmem:[%s918_s26 + $0x54] sm:$0xf] }
  0x3e   : > { %v669_v10 = vld [vmem:[%s918_s26 + $0x78] sm:$0xf0]  ;;  %395 = vmatpush.bf16.msra.mxu2 %v620_v58  ;;  %v738_v15 = vld [vmem:[%s918_s26 + $0x6c] sm:$0xf0]  ;;  %v661_v18 = vld [vmem:[%s918_s26 + $0x70] sm:$0xf0] }
  0x3f   : > { %408 = vmatpush.bf16.msra.mxu3 %v624_v62  ;;  %v672_v17 = vor.u32 %v735_v9, %v669_v10  ;;  %v635_v19 = vld [vmem:[%s918_s26 + $0x18] sm:$0xf]  ;;  %v727_v21 = vld [vmem:[%s918_s26 + $0x1c] sm:$0xf]  ;;  %v660_v23 = vor.u32 %v738_v15, %v659_v14  ;;  %v664_v24 = vor.u32 %v734_v16, %v661_v18  ;;  %v627_v26 = vld [vmem:[%s918_s26 + $0x10] sm:$0xf] }
  0x40   : > { %705 = vmatmul.msk.bf16.vlgmr.msra.gmra.mxu0 %vm358_vm0, %v213_v63  ;;  %v731_v20 = vld [vmem:[%s918_s26 + $0x34] sm:$0xf0]  ;;  %706 = vmatmul.msk.bf16.vlgmr.msra.gmra.mxu1 %vm358_vm0, %v213_v63  ;;  %v637_v22 = vld [vmem:[%s918_s26 + $0x38] sm:$0xf0]  ;;  %v730_v27 = vld [vmem:[%s918_s26 + $0x2c] sm:$0xf0] }
  0x41   : > { %707 = vmatmul.msk.bf16.vlgmr.msra.gmra.mxu2 %vm358_vm0, %v213_v63  ;;  %419 = vmatpush.bf16.msrb.mxu0 %v692_v11  ;;  %v636_v25 = vor.u32 %v731_v20, %v635_v19  ;;  %v640_v28 = vor.u32 %v727_v21, %v637_v22  ;;  %v726_v29 = vld [vmem:[%s918_s26 + $0x14] sm:$0xf]  ;;  %v628_v31 = vor.u32 %v730_v27, %v627_v26  ;;  %s608_s30 = sshll.u32 %s1007_s29, 2 }
  0x42   : > { %445 = vmatpush.bf16.msrb.mxu2 %v700_v0  ;;  %708 = vmatmul.msk.bf16.vlgmr.msra.gmra.mxu3 %vm358_vm0, %v213_v63  ;;  %v629_v30 = vld [vmem:[%s918_s26 + $0x30] sm:$0xf0]  ;;  %s984_s5 = scalar_lea.vmem %s1002_s2, %s608_s30 }
  0x43   : > { %458 = vmatpush.bf16.msrb.mxu3 %v704_v4  ;;  %432 = vmatpush.bf16.msrb.mxu1 %v696_v12  ;;  %v632_v32 = vor.u32 %v726_v29, %v629_v30 }
  0x45   : > { %420 = vmatpush.bf16.msrb.mxu0 %v660_v23 }
  0x46   : > { %446 = vmatpush.bf16.msrb.mxu2 %v668_v13 }
  0x47   : > { %459 = vmatpush.bf16.msrb.mxu3 %v672_v17  ;;  %433 = vmatpush.bf16.msrb.mxu1 %v664_v24 }
  0x49   : > { %421 = vmatpush.bf16.msrb.mxu0 %v628_v31 }
  0x4a   : > { %447 = vmatpush.bf16.msrb.mxu2 %v636_v25 }
  0x4b   : > { %460 = vmatpush.bf16.msrb.mxu3 %v640_v28  ;;  %434 = vmatpush.bf16.msrb.mxu1 %v632_v32 }
  0x50   : > { %709 = vmatmul.msk.bf16.vlgmr.msrb.gmra.mxu0 %vm358_vm0, %v213_v63  ;;  %710 = vmatmul.msk.bf16.vlgmr.msrb.gmra.mxu1 %vm358_vm0, %v213_v63 }
  0x51   : > { %711 = vmatmul.msk.bf16.vlgmr.msrb.gmra.mxu2 %vm358_vm0, %v213_v63 }
  0x52   : > { %712 = vmatmul.msk.bf16.vlgmr.msrb.gmra.mxu3 %vm358_vm0, %v213_v63 }
  0xbd   : > { %v371_v33 = vpop.f32.mrf.mxu0  ;;  %v384_v35 = vpop.f32.mrf.mxu1 }
  0xbe   : > { %v466_v34 = vmin.f32 %v371_v33, 0.0  ;;  %v467_v36 = vmin.f32 %v384_v35, 0.0  ;;  %vm506_vm1 = vcmp.gt.f32.partialorder %v371_v33, 0.0  ;;  %vm507_vm2 = vcmp.gt.f32.partialorder %v384_v35, 0.0 }
  0xc0   : > { %v474_v37 = vmul.f32 1.442695, %v466_v34  ;;  %v476_v38 = vmul.f32 1.442695, %v467_v36 }
  0xc2   : > { %774 = vpow2.f32 %v474_v37 }
  0xc3   : > { %776 = vpow2.f32 %v476_v38 }
  0xc4   : > { %v397_v39 = vpop.f32.mrf.mxu2 }
  0xc5   : > { %v468_v40 = vmin.f32 %v397_v39, 0.0  ;;  %v410_v41 = vpop.f32.mrf.mxu3  ;;  %v373_v42 = vpop.f32.mrf.mxu0  ;;  %vm508_vm3 = vcmp.gt.f32.partialorder %v397_v39, 0.0 }
  0xc6   : > { %v469_v43 = vmin.f32 %v410_v41, 0.0  ;;  %v386_v44 = vpop.f32.mrf.mxu1  ;;  %vm509_vm4 = vcmp.gt.f32.partialorder %v410_v41, 0.0 }
  0xc7   : > { %v478_v45 = vmul.f32 1.442695, %v468_v40 }
  0xc8   : > { %v775_v46 = vpop.eup %774  ;;  %v480_v47 = vmul.f32 1.442695, %v469_v43 }
  0xc9   : > { %v777_v48 = vpop.eup %776  ;;  %v713_v49 = vadd.f32 -1.0, %v775_v46  ;;  %778 = vpow2.f32 %v478_v45 }
  0xca   : > { %v714_v50 = vadd.f32 -1.0, %v777_v48  ;;  %780 = vpow2.f32 %v480_v47 }
  0xcb   : > { %v498_v51 = vmul.f32 1.6732632, %v713_v49 }
  0xcc   : > { %v499_v52 = vmul.f32 1.6732632, %v714_v50  ;;  %v399_v53 = vpop.f32.mrf.mxu2 }
  0xcd   : > { %v514_v54 = vsel %vm506_vm1, %v371_v33, %v498_v51  ;;  %v412_v55 = vpop.f32.mrf.mxu3  ;;  %v423_v56 = vpop.f32.mrf.mxu0 }
  0xce   : > { %v522_v57 = vmul.f32 1.050701, %v514_v54  ;;  %v515_v58 = vsel %vm507_vm2, %v384_v35, %v499_v52  ;;  %v470_v59 = vmin.f32 %v423_v56, 0.0  ;;  %v436_v60 = vpop.f32.mrf.mxu1  ;;  %vm510_vm5 = vcmp.gt.f32.partialorder %v423_v56, 0.0 }
  0xcf   : > { %v779_v61 = vpop.eup %778  ;;  %v523_v62 = vmul.f32 1.050701, %v515_v58  ;;  %v471_v63 = vmin.f32 %v436_v60, 0.0  ;;  %vm511_vm6 = vcmp.gt.f32.partialorder %v436_v60, 0.0 }
  0xd0   : > { %v781_v0 = vpop.eup %780  ;;  %v715_v1 = vadd.f32 -1.0, %v779_v61  ;;  %v482_v2 = vmul.f32 1.442695, %v470_v59 }
  0xd1   : > { %v530_v3 = vpack.c.bf16 %v523_v62, %v522_v57  ;;  %v716_v4 = vadd.f32 -1.0, %v781_v0  ;;  %v484_v5 = vmul.f32 1.442695, %v471_v63 }
  0xd2   : > { %v500_v6 = vmul.f32 1.6732632, %v715_v1  ;;  %782 = vpow2.f32 %v482_v2 }
  0xd3   : > { %534 = vst [vmem:[%s984_s5] sm:$0xff] %v530_v3  ;;  %v501_v7 = vmul.f32 1.6732632, %v716_v4  ;;  %784 = vpow2.f32 %v484_v5 }
  0xd4   : > { %v516_v8 = vsel %vm508_vm3, %v397_v39, %v500_v6  ;;  %v449_v9 = vpop.f32.mrf.mxu2 }
  0xd5   : > { %v524_v10 = vmul.f32 1.050701, %v516_v8  ;;  %v517_v11 = vsel %vm509_vm4, %v410_v41, %v501_v7  ;;  %v472_v12 = vmin.f32 %v449_v9, 0.0  ;;  %v462_v13 = vpop.f32.mrf.mxu3  ;;  %v425_v14 = vpop.f32.mrf.mxu0  ;;  %vm512_vm7 = vcmp.gt.f32.partialorder %v449_v9, 0.0 }
  0xd6   : > { %v525_v15 = vmul.f32 1.050701, %v517_v11  ;;  %v473_v16 = vmin.f32 %v462_v13, 0.0  ;;  %v438_v17 = vpop.f32.mrf.mxu1  ;;  %vm513_vm8 = vcmp.gt.f32.partialorder %v462_v13, 0.0 }
  0xd7   : > { %v486_v18 = vmul.f32 1.442695, %v472_v12 }
  0xd8   : > { %v783_v19 = vpop.eup %782  ;;  %v531_v20 = vpack.c.bf16 %v525_v15, %v524_v10  ;;  %v488_v21 = vmul.f32 1.442695, %v473_v16 }
  0xd9   : > { %v785_v22 = vpop.eup %784  ;;  %v717_v23 = vadd.f32 -1.0, %v783_v19  ;;  %786 = vpow2.f32 %v486_v18 }
  0xda   : > { %535 = vst [vmem:[%s984_s5 + $0x8] sm:$0xff] %v531_v20  ;;  %v718_v24 = vadd.f32 -1.0, %v785_v22  ;;  %788 = vpow2.f32 %v488_v21 }
  0xdb   : > { %v502_v25 = vmul.f32 1.6732632, %v717_v23 }
  0xdc   : > { %v503_v26 = vmul.f32 1.6732632, %v718_v24  ;;  %v451_v27 = vpop.f32.mrf.mxu2 }
  0xdd   : > { %v518_v28 = vsel %vm510_vm5, %v423_v56, %v502_v25  ;;  %v464_v29 = vpop.f32.mrf.mxu3 }
  0xde   : > { %v526_v30 = vmul.f32 1.050701, %v518_v28  ;;  %v519_v31 = vsel %vm511_vm6, %v436_v60, %v503_v26 }
  0xdf   : > { %v787_v32 = vpop.eup %786  ;;  %v527_v33 = vmul.f32 1.050701, %v519_v31 }
  0xe0   : > { %v789_v34 = vpop.eup %788  ;;  %v719_v35 = vadd.f32 -1.0, %v787_v32 }
  0xe1   : > { %v532_v36 = vpack.c.bf16 %v527_v33, %v526_v30  ;;  %v720_v37 = vadd.f32 -1.0, %v789_v34 }
  0xe2   : > { %v504_v38 = vmul.f32 1.6732632, %v719_v35 }
  0xe3   : > { %536 = vst [vmem:[%s984_s5 + $0x10] sm:$0xff] %v532_v36  ;;  %v505_v39 = vmul.f32 1.6732632, %v720_v37 }
  0xe4   : > { %v520_v40 = vsel %vm512_vm7, %v449_v9, %v504_v38 }
  0xe5   : > { %v528_v41 = vmul.f32 1.050701, %v520_v40  ;;  %v521_v42 = vsel %vm513_vm8, %v462_v13, %v505_v39 }
  0xe6   : > { %v529_v43 = vmul.f32 1.050701, %v521_v42 }
  0xe8   : > { %v533_v44 = vpack.c.bf16 %v529_v43, %v528_v41 }
  0xea   : > { %537 = vst [vmem:[%s984_s5 + $0x18] sm:$0xff] %v533_v44 }
  0xeb PF: > { %p9_p9 = scmp.ge.s32.totalorder %s846_s13, 4   ;;  %s1003_s9 = smov %s808_s10 }
  0xec   : > { %s1004_s10 = smov %s855_s16  ;;  %s1005_s11 = smov %s846_s13 }
  0xed   :  { %11 = sbr.rel (!%p9_p9) target bundleno = 2 (0x2), region = 86 }

// kernel: d_stage1_forward.5
= control target key start
LH: loop header
LB: loop body
LE: loop exit
PB: predicated region body
PF: predicated region fallthrough
CT: control target
= control target key end

     0   :  { %s684_s9 = smov 0   ;;  %s686_s10 = smov 0   ;;  %s803_s0 = inlined_call_operand.vmem [shape: bf16[16,128], index: 0, kind: input, shape index: {}]   ;;  %s804_s1 = inlined_call_operand.vmem [shape: bf16[128,512], index: 1, kind: input, shape index: {}]   ;;  %s805_s2 = inlined_call_operand.vmem [shape: bf16[16,512], index: 2, kind: output, shape index: {}]  }
   0x1   :  { %s688_s11 = smov 0  }
   0x2 LB: > { %s507_s12 = sadd.s32 4294967295, %s667_s11   ;;  %s701_s13 = sadd.s32 1, %s667_s11   ;;  %s667_s11 = sphi %s688_s11, %s809_s11   ;;  %s663_s10 = sphi %s686_s10, %s808_s10   ;;  %s659_s9 = sphi %s684_s9, %s807_s9  }
   0x3   : > { %s37_s14 = ssub.s32 %s667_s11, %s701_s13  ;;  %s40_s15 = sadd.s32 1, %s663_s10 }
   0x4   : > { %p38_p0 = scmp.eq.s32.totalorder %s37_s14, 0  ;;  %p47_p1 = scmp.ne.s32.totalorder %s663_s10, %s659_s9 }
   0x5   : > { %p48_p2 = scmp.eq.s32.totalorder %s667_s11, 0  ;;  %p77_p3 = scmp.eq.s32.totalorder %s507_s12, 1 }
   0x6   : > { %s712_s16 = scalar_select %p38_p0, %s663_s10, %s40_s15  }
   0x7   : > { %p49_p4 = por %p48_p2, %p47_p1  ;;  %p714_p5 = por %p77_p3, %p47_p1 }
   0x8   : > { %p510_p6 = scmp.ge.s32.totalorder %s667_s11, 2 }
   0xa   : > { %102 = sbr.rel (%p510_p6) target bundleno = 35 (0x23), region = 20 }
   0xf   : > { %105 = sbr.rel (!%p49_p4) target bundleno = 35 (0x23), region = 24  ;;  %s107_s18 = sand.u32 (%p49_p4), 1, %s663_s10  }
  0x10   : > { %s594_s19 = sshll.u32 (%p49_p4), %s667_s11, 3  ;;  %s511_s20 = sshll.u32 (%p49_p4), %s107_s18, 7 }
  0x11   : > { %s724_s23 = scalar_lea.vmem (%p49_p4), %s804_s1, %s594_s19  ;;  %s109_s24 = scalar_lea.vmem (%p49_p4), [#allocation2], %s511_s20 }
  0x12   : > { %v171_v0 = vld [vmem:[%s724_s23] sm:$0xff] (%p49_p4)  ;;  %v173_v1 = vld [vmem:[%s724_s23 + $0x10] sm:$0xff] (%p49_p4) }
  0x13   : > { %v175_v2 = vld [vmem:[%s724_s23 + $0x20] sm:$0xff] (%p49_p4)  ;;  %172 = vst [vmem:[%s109_s24] sm:$0xff] (%p49_p4), %v171_v0  ;;  %v177_v3 = vld [vmem:[%s724_s23 + $0x30] sm:$0xff] (%p49_p4) }
  0x14   : > { %174 = vst [vmem:[%s109_s24 + $0x8] sm:$0xff] %v173_v1  ;;  %v179_v4 = vld [vmem:[%s724_s23 + $0x40] sm:$0xff]  ;;  %v181_v5 = vld [vmem:[%s724_s23 + $0x50] sm:$0xff] }
  0x15   : > { %176 = vst [vmem:[%s109_s24 + $0x10] sm:$0xff] %v175_v2  ;;  %v183_v6 = vld [vmem:[%s724_s23 + $0x60] sm:$0xff]  ;;  %v185_v7 = vld [vmem:[%s724_s23 + $0x70] sm:$0xff] }
  0x16   : > { %178 = vst [vmem:[%s109_s24 + $0x18] sm:$0xff] %v177_v3  ;;  %v187_v8 = vld [vmem:[%s724_s23 + $0x80] sm:$0xff]  ;;  %v189_v9 = vld [vmem:[%s724_s23 + $0x90] sm:$0xff] }
  0x17   : > { %180 = vst [vmem:[%s109_s24 + $0x20] sm:$0xff] %v179_v4  ;;  %v191_v10 = vld [vmem:[%s724_s23 + $0xa0] sm:$0xff]  ;;  %v193_v11 = vld [vmem:[%s724_s23 + $0xb0] sm:$0xff] }
  0x18   : > { %182 = vst [vmem:[%s109_s24 + $0x28] sm:$0xff] %v181_v5  ;;  %v195_v12 = vld [vmem:[%s724_s23 + $0xc0] sm:$0xff]  ;;  %v197_v13 = vld [vmem:[%s724_s23 + $0xd0] sm:$0xff] }
  0x19   : > { %184 = vst [vmem:[%s109_s24 + $0x30] sm:$0xff] %v183_v6  ;;  %v199_v14 = vld [vmem:[%s724_s23 + $0xe0] sm:$0xff]  ;;  %v201_v15 = vld [vmem:[%s724_s23 + $0xf0] sm:$0xff] }
  0x1a   : > { %186 = vst [vmem:[%s109_s24 + $0x38] sm:$0xff] %v185_v7 }
  0x1b   : > { %188 = vst [vmem:[%s109_s24 + $0x40] sm:$0xff] %v187_v8 }
  0x1c   : > { %190 = vst [vmem:[%s109_s24 + $0x48] sm:$0xff] %v189_v9 }
  0x1d   : > { %192 = vst [vmem:[%s109_s24 + $0x50] sm:$0xff] %v191_v10 }
  0x1e   : > { %194 = vst [vmem:[%s109_s24 + $0x58] sm:$0xff] %v193_v11 }
  0x1f   : > { %196 = vst [vmem:[%s109_s24 + $0x60] sm:$0xff] %v195_v12 }
  0x20   : > { %198 = vst [vmem:[%s109_s24 + $0x68] sm:$0xff] %v197_v13 }
  0x21   : > { %200 = vst [vmem:[%s109_s24 + $0x70] sm:$0xff] %v199_v14 }
  0x22   : > { %202 = vst [vmem:[%s109_s24 + $0x78] sm:$0xff] %v201_v15 }
  0x23 PF: > { %p514_p7 = scmp.ge.s32.totalorder %s667_s11, 1  ;;  %p207_p8 = scmp.lt.s32.totalorder %s667_s11, 3 }
  0x25   : > { %p208_p9 = pnand %p514_p7, %p207_p8 }
  0x26   : > { %s214_s25 = sand.u32 (!%p208_p9), 1, %s659_s9  }
  0x27   : > { %211 = sbr.rel (%p208_p9) target bundleno = 242 (0xf2), region = 62  ;;  %s515_s26 = sshll.u32 (!%p208_p9), %s214_s25, 7 }
  0x28   : > { %s747_s27 = scalar_lea.vmem (!%p208_p9), [#allocation2], %s515_s26  ;;  %s516_s30 = sshll.u32 (!%p208_p9), %s214_s25, 4 }
  0x29   : > { %s233_s3 = scalar_lea.vmem (!%p208_p9), [#allocation3], %s516_s30 }
  0x2c   : > { %v579_v16 = vld [vmem:[%s747_s27 + $0x70] sm:$0xf]  ;;  %v611_v17 = vld [vmem:[%s747_s27 + $0x74] sm:$0xf0]  ;;  %v610_v18 = vld [vmem:[%s747_s27 + $0x74] sm:$0xf] }
  0x2d   : > { %v580_v19 = vor.u32 %v611_v17, %v579_v16  ;;  %v581_v20 = vld [vmem:[%s747_s27 + $0x78] sm:$0xf0]  ;;  %v571_v21 = vld [vmem:[%s747_s27 + $0x60] sm:$0xf]  ;;  %v609_v22 = vld [vmem:[%s747_s27 + $0x64] sm:$0xf0] }
  0x2e   : > { %v584_v23 = vor.u32 %v610_v18, %v581_v20  ;;  %v608_v24 = vld [vmem:[%s747_s27 + $0x64] sm:$0xf]  ;;  %v573_v25 = vld [vmem:[%s747_s27 + $0x68] sm:$0xf0]  ;;  %v572_v26 = vor.u32 %v609_v22, %v571_v21  ;;  %v563_v28 = vld [vmem:[%s747_s27 + $0x50] sm:$0xf] }
  0x2f   : > { %340 = vmatpush.bf16.msra.mxu0 %v580_v19  ;;  %v576_v27 = vor.u32 %v608_v24, %v573_v25  ;;  %v607_v29 = vld [vmem:[%s747_s27 + $0x54] sm:$0xf0]  ;;  %v606_v30 = vld [vmem:[%s747_s27 + $0x54] sm:$0xf]  ;;  %v565_v31 = vld [vmem:[%s747_s27 + $0x58] sm:$0xf0] }
  0x30   : > { %354 = vmatpush.bf16.msra.mxu1 %v584_v23  ;;  %v564_v32 = vor.u32 %v607_v29, %v563_v28  ;;  %v568_v33 = vor.u32 %v606_v30, %v565_v31  ;;  %v555_v34 = vld [vmem:[%s747_s27 + $0x40] sm:$0xf]  ;;  %v605_v35 = vld [vmem:[%s747_s27 + $0x44] sm:$0xf0]  ;;  %v604_v36 = vld [vmem:[%s747_s27 + $0x44] sm:$0xf] }
  0x31   : > { %v557_v37 = vld [vmem:[%s747_s27 + $0x48] sm:$0xf0]  ;;  %v556_v38 = vor.u32 %v605_v35, %v555_v34  ;;  %v547_v40 = vld [vmem:[%s747_s27 + $0x30] sm:$0xf]  ;;  %v603_v41 = vld [vmem:[%s747_s27 + $0x34] sm:$0xf0] }
  0x32   : > { %v560_v39 = vor.u32 %v604_v36, %v557_v37  ;;  %v602_v42 = vld [vmem:[%s747_s27 + $0x34] sm:$0xf]  ;;  %v549_v43 = vld [vmem:[%s747_s27 + $0x38] sm:$0xf0]  ;;  %v548_v44 = vor.u32 %v603_v41, %v547_v40  ;;  %v539_v46 = vld [vmem:[%s747_s27 + $0x20] sm:$0xf] }
  0x33   : > { %341 = vmatpush.bf16.msra.mxu0 %v572_v26  ;;  %v552_v45 = vor.u32 %v602_v42, %v549_v43  ;;  %v601_v47 = vld [vmem:[%s747_s27 + $0x24] sm:$0xf0]  ;;  %v600_v48 = vld [vmem:[%s747_s27 + $0x24] sm:$0xf]  ;;  %v541_v49 = vld [vmem:[%s747_s27 + $0x28] sm:$0xf0] }
  0x34   : > { %355 = vmatpush.bf16.msra.mxu1 %v576_v27  ;;  %v540_v50 = vor.u32 %v601_v47, %v539_v46  ;;  %v544_v51 = vor.u32 %v600_v48, %v541_v49  ;;  %v531_v52 = vld [vmem:[%s747_s27 + $0x10] sm:$0xf]  ;;  %v599_v53 = vld [vmem:[%s747_s27 + $0x14] sm:$0xf0]  ;;  %v598_v54 = vld [vmem:[%s747_s27 + $0x14] sm:$0xf] }
  0x35   : > { %v533_v55 = vld [vmem:[%s747_s27 + $0x18] sm:$0xf0]  ;;  %v532_v56 = vor.u32 %v599_v53, %v531_v52  ;;  %v523_v58 = vld [vmem:[%s747_s27] sm:$0xf]  ;;  %v597_v59 = vld [vmem:[%s747_s27 + $0x4] sm:$0xf0] }
  0x36   : > { %v536_v57 = vor.u32 %v598_v54, %v533_v55  ;;  %v596_v60 = vld [vmem:[%s747_s27 + $0x4] sm:$0xf]  ;;  %v525_v61 = vld [vmem:[%s747_s27 + $0x8] sm:$0xf0]  ;;  %v524_v62 = vor.u32 %v597_v59, %v523_v58  ;;  %s612_s4 = sshll.u32 (%p714_p5), %s507_s12, 3 }
  0x37   : > { %342 = vmatpush.bf16.msra.mxu0 %v564_v32  ;;  %v528_v63 = vor.u32 %v596_v60, %v525_v61  ;;  %v595_v0 = vld [vmem:[%s803_s0] sm:$0xff]  ;;  %s413_s7 = scalar_lea.vmem (%p714_p5), %s805_s2, %s612_s4 }
  0x38   : > { %356 = vmatpush.bf16.msra.mxu1 %v568_v33 }
  0x3b   : > { %343 = vmatpush.bf16.msra.mxu0 %v556_v38 }
  0x3c   : > { %357 = vmatpush.bf16.msra.mxu1 %v560_v39 }
  0x3f   : > { %344 = vmatpush.bf16.msra.mxu0 %v548_v44 }
  0x40   : > { %358 = vmatpush.bf16.msra.mxu1 %v552_v45 }
  0x43   : > { %345 = vmatpush.bf16.msra.mxu0 %v540_v50 }
  0x44   : > { %359 = vmatpush.bf16.msra.mxu1 %v544_v51 }
  0x47   : > { %346 = vmatpush.bf16.msra.mxu0 %v532_v56 }
  0x48   : > { %360 = vmatpush.bf16.msra.mxu1 %v536_v57 }
  0x4b   : > { %347 = vmatpush.bf16.msra.mxu0 %v524_v62 }
  0x4c   : > { %361 = vmatpush.bf16.msra.mxu1 %v528_v63 }
  0x4e   : > { %348 = vmatmul.bf16.vlgmr.msra.gmra.mxu0 %v595_v0 }
  0x4f   : > { %362 = vmatmul.bf16.vlgmr.msra.gmra.mxu1 %v595_v0 }
  0xcb   : > { %v349_v1 = vpop.f32.mrf.mxu0 }
  0xcc   : > { %v368_v2 = vmin.f32 %v349_v1, 0.0  ;;  %v363_v3 = vpop.f32.mrf.mxu1  ;;  %vm388_vm0 = vcmp.gt.f32.partialorder %v349_v1, 0.0 }
  0xcd   : > { %v369_v4 = vmin.f32 %v363_v3, 0.0  ;;  %vm389_vm1 = vcmp.gt.f32.partialorder %v363_v3, 0.0 }
  0xce   : > { %v372_v5 = vmul.f32 1.442695, %v368_v2 }
  0xcf   : > { %v374_v6 = vmul.f32 1.442695, %v369_v4 }
  0xd0   : > { %637 = vpow2.f32 %v372_v5 }
  0xd1   : > { %639 = vpow2.f32 %v374_v6 }
  0xd3   : > { %v351_v7 = vpop.f32.mrf.mxu0 }
  0xd4   : > { %v370_v8 = vmin.f32 %v351_v7, 0.0  ;;  %v365_v9 = vpop.f32.mrf.mxu1  ;;  %vm390_vm2 = vcmp.gt.f32.partialorder %v351_v7, 0.0 }
  0xd5   : > { %v371_v10 = vmin.f32 %v365_v9, 0.0  ;;  %vm391_vm3 = vcmp.gt.f32.partialorder %v365_v9, 0.0 }
  0xd6   : > { %v638_v11 = vpop.eup %637  ;;  %v376_v12 = vmul.f32 1.442695, %v370_v8 }
  0xd7   : > { %v640_v13 = vpop.eup %639  ;;  %v585_v14 = vadd.f32 -1.0, %v638_v11  ;;  %v378_v15 = vmul.f32 1.442695, %v371_v10 }
  0xd8   : > { %v586_v16 = vadd.f32 -1.0, %v640_v13  ;;  %641 = vpow2.f32 %v376_v12 }
  0xd9   : > { %v384_v17 = vmul.f32 1.6732632, %v585_v14  ;;  %643 = vpow2.f32 %v378_v15 }
  0xda   : > { %v385_v18 = vmul.f32 1.6732632, %v586_v16 }
  0xdb   : > { %v392_v19 = vsel %vm388_vm0, %v349_v1, %v384_v17 }
  0xdc   : > { %v396_v20 = vmul.f32 1.050701, %v392_v19  ;;  %v393_v21 = vsel %vm389_vm1, %v363_v3, %v385_v18 }
  0xdd   : > { %v397_v22 = vmul.f32 1.050701, %v393_v21 }
  0xde   : > { %v642_v23 = vpop.eup %641 }
  0xdf   : > { %v644_v24 = vpop.eup %643  ;;  %v400_v25 = vpack.c.bf16 %v397_v22, %v396_v20  ;;  %v587_v26 = vadd.f32 -1.0, %v642_v23 }
  0xe0   : > { %v588_v27 = vadd.f32 -1.0, %v644_v24 }
  0xe1   : > { %v386_v28 = vmul.f32 1.6732632, %v587_v26  ;;  %402 = vst [vmem:[%s233_s3] sm:$0xff] %v400_v25 }
  0xe2   : > { %v387_v29 = vmul.f32 1.6732632, %v588_v27 }
  0xe3   : > { %v394_v30 = vsel %vm390_vm2, %v351_v7, %v386_v28 }
  0xe4   : > { %v398_v31 = vmul.f32 1.050701, %v394_v30  ;;  %v395_v32 = vsel %vm391_vm3, %v365_v9, %v387_v29 }
  0xe5   : > { %v399_v33 = vmul.f32 1.050701, %v395_v32  ;;  %410 = sbr.rel (!%p714_p5) target bundleno = 242 (0xf2), region = 70 }
  0xe7   : > { %v401_v34 = vpack.c.bf16 %v399_v33, %v398_v31 }
  0xe8   : > { %v444_v35 = vld [vmem:[%s233_s3] sm:$0xff] (%p714_p5) }
  0xe9   : > { %403 = vst [vmem:[%s233_s3 + $0x8] sm:$0xff] %v401_v34 }
  0xea   : > { %445 = vst [vmem:[%s413_s7] sm:$0xff] %v444_v35 }
  0xf0   : > { %v446_v36 = vld [vmem:[%s233_s3 + $0x8] sm:$0xff] }
  0xf1   : > { %447 = vst [vmem:[%s413_s7 + $0x10] sm:$0xff] %v446_v36 }
  0xf2 PF: > { %p9_p10 = scmp.ge.s32.totalorder %s701_s13, 4   ;;  %s807_s9 = smov %s663_s10 }
  0xf3   : > { %s808_s10 = smov %s712_s16  ;;  %s809_s11 = smov %s701_s13 }
  0xf4   :  { %11 = sbr.rel (!%p9_p10) target bundleno = 2 (0x2), region = 139 }

// kernel: d_stage1_forward.6
= control target key start
LH: loop header
LB: loop body
LE: loop exit
PB: predicated region body
PF: predicated region fallthrough
CT: control target
= control target key end

     0   :  { %s477_s1 = inlined_call_operand.vmem [shape: bf16[256,128], index: 1, kind: input, shape index: {}]   ;;  %s478_s0 = inlined_call_operand.vmem [shape: bf16[32,256], index: 0, kind: input, shape index: {}]   ;;  %s479_s2 = inlined_call_operand.vmem [shape: bf16[32,128], index: 2, kind: output, shape index: {}]  }
   0x1   :  { %v340_v0 = vld [vmem:[%s477_s1 + $0x38] sm:$0xff]  ;;  %v339_v2 = vld [vmem:[%s477_s1 + $0x30] sm:$0xff]  ;;  %v338_v4 = vld [vmem:[%s477_s1 + $0x28] sm:$0xff] }
   0x2   :  { %v348_v1 = vld [vmem:[%s477_s1 + $0x78] sm:$0xff]  ;;  %163 = vmatpush.bf16.msra.mxu0 %v340_v0  ;;  %360 = vmatpush.bf16.msra.mxu2 %v340_v0  ;;  %v347_v3 = vld [vmem:[%s477_s1 + $0x70] sm:$0xff]  ;;  %v346_v5 = vld [vmem:[%s477_s1 + $0x68] sm:$0xff] }
   0x3   :  { %182 = vmatpush.bf16.msra.mxu1 %v348_v1  ;;  %368 = vmatpush.bf16.msra.mxu3 %v348_v1  ;;  %v337_v6 = vld [vmem:[%s477_s1 + $0x20] sm:$0xff]  ;;  %v336_v8 = vld [vmem:[%s477_s1 + $0x18] sm:$0xff]  ;;  %v335_v10 = vld [vmem:[%s477_s1 + $0x10] sm:$0xff] }
   0x4   :  { %v345_v7 = vld [vmem:[%s477_s1 + $0x60] sm:$0xff]  ;;  %v344_v9 = vld [vmem:[%s477_s1 + $0x58] sm:$0xff]  ;;  %v343_v11 = vld [vmem:[%s477_s1 + $0x50] sm:$0xff] }
   0x5   :  { %v334_v12 = vld [vmem:[%s477_s1 + $0x8] sm:$0xff]  ;;  %v333_v14 = vld [vmem:[%s477_s1] sm:$0xff]  ;;  %v255_v18 = vld [vmem:[%s478_s0 + $0x10] sm:$0xf] }
   0x6   :  { %164 = vmatpush.bf16.msra.mxu0 %v339_v2  ;;  %361 = vmatpush.bf16.msra.mxu2 %v339_v2  ;;  %v342_v13 = vld [vmem:[%s477_s1 + $0x48] sm:$0xff]  ;;  %v341_v15 = vld [vmem:[%s477_s1 + $0x40] sm:$0xff]  ;;  %v332_v19 = vld [vmem:[%s478_s0 + $0x14] sm:$0xf0] }
   0x7   :  { %183 = vmatpush.bf16.msra.mxu1 %v347_v3  ;;  %369 = vmatpush.bf16.msra.mxu3 %v347_v3  ;;  %v247_v16 = vld [vmem:[%s478_s0] sm:$0xf]  ;;  %v330_v17 = vld [vmem:[%s478_s0 + $0x4] sm:$0xf0]  ;;  %v329_v20 = vld [vmem:[%s478_s0 + $0x4] sm:$0xf]  ;;  %v256_v25 = vor.u32 %v332_v19, %v255_v18 }
   0x8   :  { %v249_v21 = vld [vmem:[%s478_s0 + $0x8] sm:$0xf0]  ;;  %v331_v22 = vld [vmem:[%s478_s0 + $0x14] sm:$0xf]  ;;  %v257_v23 = vld [vmem:[%s478_s0 + $0x18] sm:$0xf0]  ;;  %v248_v24 = vor.u32 %v330_v17, %v247_v16 }
   0x9   :  { %v252_v26 = vor.u32 %v329_v20, %v249_v21  ;;  %v260_v27 = vor.u32 %v331_v22, %v257_v23 }
   0xa   :  { %165 = vmatpush.bf16.msra.mxu0 %v338_v4  ;;  %362 = vmatpush.bf16.msra.mxu2 %v338_v4 }
   0xb   :  { %184 = vmatpush.bf16.msra.mxu1 %v346_v5  ;;  %370 = vmatpush.bf16.msra.mxu3 %v346_v5 }
   0xe   :  { %166 = vmatpush.bf16.msra.mxu0 %v337_v6  ;;  %363 = vmatpush.bf16.msra.mxu2 %v337_v6 }
   0xf   :  { %185 = vmatpush.bf16.msra.mxu1 %v345_v7  ;;  %371 = vmatpush.bf16.msra.mxu3 %v345_v7 }
  0x12   :  { %167 = vmatpush.bf16.msra.mxu0 %v336_v8  ;;  %364 = vmatpush.bf16.msra.mxu2 %v336_v8 }
  0x13   :  { %186 = vmatpush.bf16.msra.mxu1 %v344_v9  ;;  %372 = vmatpush.bf16.msra.mxu3 %v344_v9 }
  0x16   :  { %168 = vmatpush.bf16.msra.mxu0 %v335_v10  ;;  %365 = vmatpush.bf16.msra.mxu2 %v335_v10 }
  0x17   :  { %187 = vmatpush.bf16.msra.mxu1 %v343_v11  ;;  %373 = vmatpush.bf16.msra.mxu3 %v343_v11 }
  0x1a   :  { %169 = vmatpush.bf16.msra.mxu0 %v334_v12  ;;  %366 = vmatpush.bf16.msra.mxu2 %v334_v12 }
  0x1b   :  { %188 = vmatpush.bf16.msra.mxu1 %v342_v13  ;;  %374 = vmatpush.bf16.msra.mxu3 %v342_v13 }
  0x1e   :  { %170 = vmatpush.bf16.msra.mxu0 %v333_v14  ;;  %367 = vmatpush.bf16.msra.mxu2 %v333_v14 }
  0x1f   :  { %189 = vmatpush.bf16.msra.mxu1 %v341_v15  ;;  %375 = vmatpush.bf16.msra.mxu3 %v341_v15 }
  0x21   :  { %171 = vmatmul.bf16.vlgmr.msra.gmra.mxu0 %v248_v24  ;;  %176 = vmatmul.bf16.vlgmr.msra.gmra.mxu2 %v256_v25 }
  0x22   :  { %190 = vmatmul.bf16.vlgmr.msra.gmra.mxu1 %v252_v26  ;;  %195 = vmatmul.bf16.vlgmr.msra.gmra.mxu3 %v260_v27 }
  0x9e   :  { %v172_v28 = vpop.f32.mrf.mxu0 }
  0x9f   :  { %v191_v29 = vpop.f32.mrf.mxu1 }
  0xa0   :  { %v192_v30 = vadd.f32 %v191_v29, %v172_v28 }
  0xa2   :  { %v201_v31 = vmin.f32 %v192_v30, 0.0  ;;  %vm221_vm0 = vcmp.gt.f32.partialorder %v192_v30, 0.0 }
  0xa4   :  { %v205_v32 = vmul.f32 1.442695, %v201_v31  ;;  %v177_v33 = vpop.f32.mrf.mxu2 }
  0xa5   :  { %v196_v34 = vpop.f32.mrf.mxu3 }
  0xa6   :  { %376 = vpow2.f32 %v205_v32  ;;  %v197_v35 = vadd.f32 %v196_v34, %v177_v33  ;;  %v174_v36 = vpop.f32.mrf.mxu0 }
  0xa7   :  { %v193_v37 = vpop.f32.mrf.mxu1 }
  0xa8   :  { %v203_v38 = vmin.f32 %v197_v35, 0.0  ;;  %v194_v39 = vadd.f32 %v193_v37, %v174_v36  ;;  %vm223_vm2 = vcmp.gt.f32.partialorder %v197_v35, 0.0 }
  0xaa   :  { %v209_v40 = vmul.f32 1.442695, %v203_v38  ;;  %v202_v41 = vmin.f32 %v194_v39, 0.0  ;;  %vm222_vm1 = vcmp.gt.f32.partialorder %v194_v39, 0.0 }
  0xac   :  { %v377_v42 = vpop.eup %376  ;;  %378 = vpow2.f32 %v209_v40  ;;  %v207_v43 = vmul.f32 1.442695, %v202_v41  ;;  %v179_v44 = vpop.f32.mrf.mxu2 }
  0xad   :  { %v198_v45 = vpop.f32.mrf.mxu3  ;;  %v325_v47 = vadd.f32 -1.0, %v377_v42 }
  0xae   :  { %380 = vpow2.f32 %v207_v43  ;;  %v199_v46 = vadd.f32 %v198_v45, %v179_v44 }
  0xaf   :  { %v217_v51 = vmul.f32 1.6732632, %v325_v47 }
  0xb0   :  { %v204_v48 = vmin.f32 %v199_v46, 0.0  ;;  %vm224_vm3 = vcmp.gt.f32.partialorder %v199_v46, 0.0 }
  0xb1   :  { %v225_v55 = vsel %vm221_vm0, %v192_v30, %v217_v51 }
  0xb2   :  { %v379_v49 = vpop.eup %378  ;;  %v211_v50 = vmul.f32 1.442695, %v204_v48  ;;  %v229_v60 = vmul.f32 1.050701, %v225_v55 }
  0xb3   :  { %v327_v53 = vadd.f32 -1.0, %v379_v49 }
  0xb4   :  { %v381_v52 = vpop.eup %380  ;;  %382 = vpow2.f32 %v211_v50 }
  0xb5   :  { %v326_v54 = vadd.f32 -1.0, %v381_v52  ;;  %v219_v57 = vmul.f32 1.6732632, %v327_v53 }
  0xb7   :  { %v218_v56 = vmul.f32 1.6732632, %v326_v54  ;;  %v227_v0 = vsel %vm223_vm2, %v197_v35, %v219_v57 }
  0xb8   :  { %v231_v3 = vmul.f32 1.050701, %v227_v0 }
  0xb9   :  { %v226_v58 = vsel %vm222_vm1, %v194_v39, %v218_v56 }
  0xba   :  { %v383_v59 = vpop.eup %382  ;;  %v230_v61 = vmul.f32 1.050701, %v226_v58 }
  0xbb   :  { %v328_v62 = vadd.f32 -1.0, %v383_v59 }
  0xbc   :  { %v352_v63 = vpack.c.bf16 %v230_v61, %v229_v60 }
  0xbd   :  { %v220_v1 = vmul.f32 1.6732632, %v328_v62 }
  0xbe   :  { %353 = vst [vmem:[%s479_s2] sm:$0xff] %v352_v63  }
  0xbf   :  { %v228_v2 = vsel %vm224_vm3, %v199_v46, %v220_v1 }
  0xc0   :  { %v232_v4 = vmul.f32 1.050701, %v228_v2 }
  0xc2   :  { %v357_v5 = vpack.c.bf16 %v232_v4, %v231_v3 }
  0xc4   :  { %359 = vst [vmem:[%s479_s2 + $0x8] sm:$0xff] %v357_v5  }

// kernel: d_stage1_forward.7
= control target key start
LH: loop header
LB: loop body
LE: loop exit
PB: predicated region body
PF: predicated region fallthrough
CT: control target
= control target key end

     0   :  { %vm551_vm1 = vcmask 257024   ;;  %s1067_s1 = inlined_call_operand.vmem [shape: bf16[512,32], index: 1, kind: input, shape index: {}]   ;;  %s1068_s0 = inlined_call_operand.vmem [shape: bf16[64,512], index: 0, kind: input, shape index: {}]   ;;  %s1069_s2 = inlined_call_operand.vmem [shape: bf16[64,32], index: 2, kind: output, shape index: {}]  }
   0x1   :  { %v787_v0 = vld [vmem:[%s1067_s1 + $0x38] sm:$0xff]  ;;  %v786_v4 = vld [vmem:[%s1067_s1 + $0x30] sm:$0xff]  ;;  %v785_v8 = vld [vmem:[%s1067_s1 + $0x28] sm:$0xff] }
   0x2   :  { %v795_v1 = vld [vmem:[%s1067_s1 + $0x78] sm:$0xff]  ;;  %363 = vmatpush.bf16.msra.mxu0 %v787_v0  ;;  %v794_v5 = vld [vmem:[%s1067_s1 + $0x70] sm:$0xff]  ;;  %v793_v9 = vld [vmem:[%s1067_s1 + $0x68] sm:$0xff] }
   0x3   :  { %v803_v2 = vld [vmem:[%s1067_s1 + $0xb8] sm:$0xff]  ;;  %392 = vmatpush.bf16.msra.mxu1 %v795_v1  ;;  %v802_v6 = vld [vmem:[%s1067_s1 + $0xb0] sm:$0xff]  ;;  %v801_v10 = vld [vmem:[%s1067_s1 + $0xa8] sm:$0xff] }
   0x4   :  { %v811_v3 = vld [vmem:[%s1067_s1 + $0xf8] sm:$0xff]  ;;  %421 = vmatpush.bf16.msra.mxu2 %v803_v2  ;;  %v810_v7 = vld [vmem:[%s1067_s1 + $0xf0] sm:$0xff]  ;;  %v809_v11 = vld [vmem:[%s1067_s1 + $0xe8] sm:$0xff] }
   0x5   :  { %450 = vmatpush.bf16.msra.mxu3 %v811_v3  ;;  %v784_v12 = vld [vmem:[%s1067_s1 + $0x20] sm:$0xff]  ;;  %v783_v16 = vld [vmem:[%s1067_s1 + $0x18] sm:$0xff]  ;;  %v782_v20 = vld [vmem:[%s1067_s1 + $0x10] sm:$0xff] }
   0x6   :  { %364 = vmatpush.bf16.msra.mxu0 %v786_v4  ;;  %v792_v13 = vld [vmem:[%s1067_s1 + $0x60] sm:$0xff]  ;;  %v791_v17 = vld [vmem:[%s1067_s1 + $0x58] sm:$0xff]  ;;  %v790_v21 = vld [vmem:[%s1067_s1 + $0x50] sm:$0xff] }
   0x7   :  { %393 = vmatpush.bf16.msra.mxu1 %v794_v5  ;;  %v800_v14 = vld [vmem:[%s1067_s1 + $0xa0] sm:$0xff]  ;;  %v799_v18 = vld [vmem:[%s1067_s1 + $0x98] sm:$0xff]  ;;  %v798_v22 = vld [vmem:[%s1067_s1 + $0x90] sm:$0xff] }
   0x8   :  { %422 = vmatpush.bf16.msra.mxu2 %v802_v6  ;;  %v808_v15 = vld [vmem:[%s1067_s1 + $0xe0] sm:$0xff]  ;;  %v807_v19 = vld [vmem:[%s1067_s1 + $0xd8] sm:$0xff]  ;;  %v806_v23 = vld [vmem:[%s1067_s1 + $0xd0] sm:$0xff] }
   0x9   :  { %451 = vmatpush.bf16.msra.mxu3 %v810_v7  ;;  %v781_v24 = vld [vmem:[%s1067_s1 + $0x8] sm:$0xff]  ;;  %v780_v28 = vld [vmem:[%s1067_s1] sm:$0xff]  ;;  %v766_v33 = vld [vmem:[%s1068_s0 + $0xc] sm:$0xf0] }
   0xa   :  { %365 = vmatpush.bf16.msra.mxu0 %v785_v8  ;;  %v789_v25 = vld [vmem:[%s1067_s1 + $0x48] sm:$0xff]  ;;  %v788_v29 = vld [vmem:[%s1067_s1 + $0x40] sm:$0xff]  ;;  %v568_v35 = vld [vmem:[%s1068_s0 + $0x10] sm:$0xf0] }
   0xb   :  { %394 = vmatpush.bf16.msra.mxu1 %v793_v9  ;;  %v797_v26 = vld [vmem:[%s1067_s1 + $0x88] sm:$0xff]  ;;  %v796_v30 = vld [vmem:[%s1067_s1 + $0x80] sm:$0xff]  ;;  %v767_v37 = vld [vmem:[%s1068_s0 + $0x14] sm:$0xf0] }
   0xc   :  { %423 = vmatpush.bf16.msra.mxu2 %v801_v10  ;;  %v805_v27 = vld [vmem:[%s1067_s1 + $0xc8] sm:$0xff]  ;;  %v804_v31 = vld [vmem:[%s1067_s1 + $0xc0] sm:$0xff]  ;;  %v576_v39 = vld [vmem:[%s1068_s0 + $0x18] sm:$0xf0] }
   0xd   :  { %452 = vmatpush.bf16.msra.mxu3 %v809_v11  ;;  %v566_v32 = vld [vmem:[%s1068_s0] sm:$0xf]  ;;  %v764_v34 = vld [vmem:[%s1068_s0 + $0x4] sm:$0xf]  ;;  %v574_v36 = vld [vmem:[%s1068_s0 + $0x8] sm:$0xf] }
   0xe   :  { %366 = vmatpush.bf16.msra.mxu0 %v784_v12  ;;  %v765_v38 = vld [vmem:[%s1068_s0 + $0xc] sm:$0xf]  ;;  %v567_v40 = vor.u32 %v766_v33, %v566_v32  ;;  %v571_v41 = vor.u32 %v764_v34, %v568_v35  ;;  %v575_v42 = vor.u32 %v767_v37, %v574_v36  ;;  %v582_v44 = vld [vmem:[%s1068_s0 + $0x20] sm:$0xf]  ;;  %v770_v45 = vld [vmem:[%s1068_s0 + $0x2c] sm:$0xf0] }
   0xf   :  { %395 = vmatpush.bf16.msra.mxu1 %v792_v13  ;;  %v579_v43 = vor.u32 %v765_v38, %v576_v39  ;;  %v768_v46 = vld [vmem:[%s1068_s0 + $0x24] sm:$0xf]  ;;  %v584_v47 = vld [vmem:[%s1068_s0 + $0x30] sm:$0xf0]  ;;  %v590_v48 = vld [vmem:[%s1068_s0 + $0x28] sm:$0xf]  ;;  %v583_v52 = vor.u32 %v770_v45, %v582_v44 }
  0x10   :  { %424 = vmatpush.bf16.msra.mxu2 %v800_v14  ;;  %v771_v49 = vld [vmem:[%s1068_s0 + $0x34] sm:$0xf0]  ;;  %v769_v50 = vld [vmem:[%s1068_s0 + $0x2c] sm:$0xf]  ;;  %v592_v51 = vld [vmem:[%s1068_s0 + $0x38] sm:$0xf0]  ;;  %v587_v53 = vor.u32 %v768_v46, %v584_v47 }
  0x11   :  { %453 = vmatpush.bf16.msra.mxu3 %v808_v15  ;;  %v591_v54 = vor.u32 %v771_v49, %v590_v48  ;;  %v595_v55 = vor.u32 %v769_v50, %v592_v51  ;;  %v598_v56 = vld [vmem:[%s1068_s0 + $0x40] sm:$0xf]  ;;  %v774_v57 = vld [vmem:[%s1068_s0 + $0x4c] sm:$0xf0]  ;;  %v772_v58 = vld [vmem:[%s1068_s0 + $0x44] sm:$0xf] }
  0x12   :  { %367 = vmatpush.bf16.msra.mxu0 %v783_v16  ;;  %v600_v59 = vld [vmem:[%s1068_s0 + $0x50] sm:$0xf0]  ;;  %v606_v60 = vld [vmem:[%s1068_s0 + $0x48] sm:$0xf]  ;;  %v775_v61 = vld [vmem:[%s1068_s0 + $0x54] sm:$0xf0]  ;;  %v599_v0 = vor.u32 %v774_v57, %v598_v56 }
  0x13   :  { %396 = vmatpush.bf16.msra.mxu1 %v791_v17  ;;  %v773_v62 = vld [vmem:[%s1068_s0 + $0x4c] sm:$0xf]  ;;  %v608_v63 = vld [vmem:[%s1068_s0 + $0x58] sm:$0xf0]  ;;  %v603_v1 = vor.u32 %v772_v58, %v600_v59  ;;  %v607_v2 = vor.u32 %v775_v61, %v606_v60  ;;  %v614_v4 = vld [vmem:[%s1068_s0 + $0x60] sm:$0xf] }
  0x14   :  { %425 = vmatpush.bf16.msra.mxu2 %v799_v18  ;;  %v611_v3 = vor.u32 %v773_v62, %v608_v63  ;;  %v778_v5 = vld [vmem:[%s1068_s0 + $0x6c] sm:$0xf0]  ;;  %v776_v6 = vld [vmem:[%s1068_s0 + $0x64] sm:$0xf]  ;;  %v616_v7 = vld [vmem:[%s1068_s0 + $0x70] sm:$0xf0] }
  0x15   :  { %454 = vmatpush.bf16.msra.mxu3 %v807_v19  ;;  %v622_v8 = vld [vmem:[%s1068_s0 + $0x68] sm:$0xf]  ;;  %v779_v9 = vld [vmem:[%s1068_s0 + $0x74] sm:$0xf0]  ;;  %v777_v10 = vld [vmem:[%s1068_s0 + $0x6c] sm:$0xf]  ;;  %v615_v12 = vor.u32 %v778_v5, %v614_v4  ;;  %v619_v13 = vor.u32 %v776_v6, %v616_v7 }
  0x16   :  { %368 = vmatpush.bf16.msra.mxu0 %v782_v20  ;;  %v624_v11 = vld [vmem:[%s1068_s0 + $0x78] sm:$0xf0]  ;;  %v623_v14 = vor.u32 %v779_v9, %v622_v8 }
  0x17   :  { %397 = vmatpush.bf16.msra.mxu1 %v790_v21  ;;  %v627_v15 = vor.u32 %v777_v10, %v624_v11 }
  0x18   :  { %426 = vmatpush.bf16.msra.mxu2 %v798_v22 }
  0x19   :  { %455 = vmatpush.bf16.msra.mxu3 %v806_v23 }
  0x1a   :  { %369 = vmatpush.bf16.msra.mxu0 %v781_v24 }
  0x1b   :  { %398 = vmatpush.bf16.msra.mxu1 %v789_v25 }
  0x1c   :  { %427 = vmatpush.bf16.msra.mxu2 %v797_v26 }
  0x1d   :  { %456 = vmatpush.bf16.msra.mxu3 %v805_v27 }
  0x1e   :  { %370 = vmatpush.bf16.msra.mxu0 %v780_v28 }
  0x1f   :  { %399 = vmatpush.bf16.msra.mxu1 %v788_v29 }
  0x20   :  { %428 = vmatpush.bf16.msra.mxu2 %v796_v30 }
  0x21   :  { %457 = vmatpush.bf16.msra.mxu3 %v804_v31  ;;  %371 = vmatmul.bf16.vlgmr.msra.gmra.mxu0 %v567_v40 }
  0x22   :  { %400 = vmatmul.bf16.vlgmr.msra.gmra.mxu1 %v571_v41 }
  0x23   :  { %429 = vmatmul.bf16.vlgmr.msra.gmra.mxu2 %v575_v42 }
  0x24   :  { %458 = vmatmul.bf16.vlgmr.msra.gmra.mxu3 %v579_v43 }
  0x31   :  { %376 = vmatmul.bf16.gmra.mxu0 %v583_v52 }
  0x32   :  { %405 = vmatmul.bf16.gmra.mxu1 %v587_v53 }
  0x33   :  { %434 = vmatmul.bf16.gmra.mxu2 %v591_v54 }
  0x34   :  { %463 = vmatmul.bf16.gmra.mxu3 %v595_v55 }
  0x41   :  { %381 = vmatmul.bf16.gmra.mxu0 %v599_v0 }
  0x42   :  { %410 = vmatmul.bf16.gmra.mxu1 %v603_v1 }
  0x43   :  { %439 = vmatmul.bf16.gmra.mxu2 %v607_v2 }
  0x44   :  { %468 = vmatmul.bf16.gmra.mxu3 %v611_v3 }
  0x51   :  { %386 = vmatmul.bf16.gmra.mxu0 %v615_v12 }
  0x52   :  { %415 = vmatmul.bf16.gmra.mxu1 %v619_v13 }
  0x53   :  { %444 = vmatmul.bf16.gmra.mxu2 %v623_v14 }
  0x54   :  { %473 = vmatmul.bf16.gmra.mxu3 %v627_v15 }
  0x9e   :  { %v372_v16 = vpop.f32.mrf.mxu0 }
  0x9f   :  { %v401_v17 = vpop.f32.mrf.mxu1 }
  0xa0   :  { %v402_v18 = vadd.f32 %v401_v17, %v372_v16 }
  0xa6   :  { %v430_v19 = vpop.f32.mrf.mxu2  ;;  %v374_v22 = vpop.f32.mrf.mxu0 }
  0xa7   :  { %v459_v20 = vpop.f32.mrf.mxu3  ;;  %v431_v21 = vadd.f32 %v430_v19, %v402_v18  ;;  %v403_v23 = vpop.f32.mrf.mxu1 }
  0xa8   :  { %v404_v27 = vadd.f32 %v403_v23, %v374_v22 }
  0xa9   :  { %v460_v24 = vadd.f32 %v459_v20, %v431_v21 }
  0xab   :  { %v479_v25 = vmin.f32 %v460_v24, 0.0  ;;  %vm519_vm0 = vcmp.gt.f32.partialorder %v460_v24, 0.0 }
  0xad   :  { %v487_v26 = vmul.f32 1.442695, %v479_v25 }
  0xae   :  { %v432_v28 = vpop.f32.mrf.mxu2  ;;  %v377_v31 = vpop.f32.mrf.mxu0 }
  0xaf   :  { %v461_v29 = vpop.f32.mrf.mxu3  ;;  %812 = vpow2.f32 %v487_v26  ;;  %v433_v30 = vadd.f32 %v432_v28, %v404_v27  ;;  %v406_v32 = vpop.f32.mrf.mxu1 }
  0xb0   :  { %v407_v35 = vadd.f32 %v406_v32, %v377_v31 }
  0xb1   :  { %v462_v33 = vadd.f32 %v461_v29, %v433_v30 }
  0xb3   :  { %v480_v34 = vmin.f32 %v462_v33, 0.0  ;;  %vm520_vm2 = vcmp.gt.f32.partialorder %v462_v33, 0.0 }
  0xb5   :  { %v813_v36 = vpop.eup %812  ;;  %v489_v37 = vmul.f32 1.442695, %v480_v34 }
  0xb6   :  { %v756_v38 = vadd.f32 -1.0, %v813_v36  ;;  %v435_v39 = vpop.f32.mrf.mxu2  ;;  %v379_v42 = vpop.f32.mrf.mxu0 }
  0xb7   :  { %v464_v40 = vpop.f32.mrf.mxu3  ;;  %814 = vpow2.f32 %v489_v37  ;;  %v436_v41 = vadd.f32 %v435_v39, %v407_v35  ;;  %v408_v43 = vpop.f32.mrf.mxu1 }
  0xb8   :  { %v511_v44 = vmul.f32 1.6732632, %v756_v38  ;;  %v409_v52 = vadd.f32 %v408_v43, %v379_v42 }
  0xb9   :  { %v465_v45 = vadd.f32 %v464_v40, %v436_v41 }
  0xba   :  { %v527_v46 = vsel %vm519_vm0, %v460_v24, %v511_v44 }
  0xbb   :  { %v535_v47 = vmul.f32 1.050701, %v527_v46  ;;  %v481_v48 = vmin.f32 %v465_v45, 0.0  ;;  %vm521_vm3 = vcmp.gt.f32.partialorder %v465_v45, 0.0 }
  0xbd   :  { %v815_v49 = vpop.eup %814  ;;  %v543_v50 = vpack.c.bf16 %v535_v47, %v535_v47  ;;  %v491_v51 = vmul.f32 1.442695, %v481_v48 }
  0xbe   :  { %v757_v53 = vadd.f32 -1.0, %v815_v49  ;;  %v437_v54 = vpop.f32.mrf.mxu2  ;;  %v382_v57 = vpop.f32.mrf.mxu0 }
  0xbf   :  { %v466_v55 = vpop.f32.mrf.mxu3  ;;  %552 = vst.msk [vmem:[%s1069_s2] sm:$0xf] %vm551_vm1, %v543_v50  ;;  %816 = vpow2.f32 %v491_v51  ;;  %v438_v56 = vadd.f32 %v437_v54, %v409_v52  ;;  %v411_v58 = vpop.f32.mrf.mxu1 }
  0xc0   :  { %v512_v59 = vmul.f32 1.6732632, %v757_v53  ;;  %v412_v0 = vadd.f32 %v411_v58, %v382_v57 }
  0xc1   :  { %v467_v60 = vadd.f32 %v466_v55, %v438_v56 }
  0xc2   :  { %v528_v61 = vsel %vm520_vm2, %v462_v33, %v512_v59 }
  0xc3   :  { %v536_v62 = vmul.f32 1.050701, %v528_v61  ;;  %v482_v63 = vmin.f32 %v467_v60, 0.0  ;;  %vm522_vm4 = vcmp.gt.f32.partialorder %v467_v60, 0.0 }
  0xc5   :  { %v817_v1 = vpop.eup %816  ;;  %v544_v2 = vpack.c.bf16 %v536_v62, %v536_v62  ;;  %v493_v3 = vmul.f32 1.442695, %v482_v63 }
  0xc6   :  { %v758_v4 = vadd.f32 -1.0, %v817_v1  ;;  %v440_v5 = vpop.f32.mrf.mxu2  ;;  %v384_v8 = vpop.f32.mrf.mxu0 }
  0xc7   :  { %v469_v6 = vpop.f32.mrf.mxu3  ;;  %553 = vst.msk [vmem:[%s1069_s2 + $0x4] sm:$0xf] %vm551_vm1, %v544_v2  ;;  %818 = vpow2.f32 %v493_v3  ;;  %v441_v7 = vadd.f32 %v440_v5, %v412_v0  ;;  %v413_v9 = vpop.f32.mrf.mxu1 }
  0xc8   :  { %v513_v10 = vmul.f32 1.6732632, %v758_v4  ;;  %v414_v18 = vadd.f32 %v413_v9, %v384_v8 }
  0xc9   :  { %v470_v11 = vadd.f32 %v469_v6, %v441_v7 }
  0xca   :  { %v529_v12 = vsel %vm521_vm3, %v465_v45, %v513_v10 }
  0xcb   :  { %v537_v13 = vmul.f32 1.050701, %v529_v12  ;;  %v483_v14 = vmin.f32 %v470_v11, 0.0  ;;  %vm523_vm5 = vcmp.gt.f32.partialorder %v470_v11, 0.0 }
  0xcd   :  { %v819_v15 = vpop.eup %818  ;;  %v545_v16 = vpack.c.bf16 %v537_v13, %v537_v13  ;;  %v495_v17 = vmul.f32 1.442695, %v483_v14 }
  0xce   :  { %v759_v19 = vadd.f32 -1.0, %v819_v15  ;;  %v442_v20 = vpop.f32.mrf.mxu2  ;;  %v387_v24 = vpop.f32.mrf.mxu0 }
  0xcf   :  { %v471_v21 = vpop.f32.mrf.mxu3  ;;  %554 = vst.msk [vmem:[%s1069_s2 + $0x8] sm:$0xf] %vm551_vm1, %v545_v16  ;;  %820 = vpow2.f32 %v495_v17  ;;  %v443_v22 = vadd.f32 %v442_v20, %v414_v18  ;;  %v416_v25 = vpop.f32.mrf.mxu1 }
  0xd0   :  { %v514_v23 = vmul.f32 1.6732632, %v759_v19  ;;  %v417_v30 = vadd.f32 %v416_v25, %v387_v24 }
  0xd1   :  { %v472_v26 = vadd.f32 %v471_v21, %v443_v22 }
  0xd2   :  { %v530_v27 = vsel %vm522_vm4, %v467_v60, %v514_v23 }
  0xd3   :  { %v538_v28 = vmul.f32 1.050701, %v530_v27  ;;  %v484_v29 = vmin.f32 %v472_v26, 0.0  ;;  %vm524_vm6 = vcmp.gt.f32.partialorder %v472_v26, 0.0 }
  0xd5   :  { %v821_v31 = vpop.eup %820  ;;  %v546_v32 = vpack.c.bf16 %v538_v28, %v538_v28  ;;  %v497_v33 = vmul.f32 1.442695, %v484_v29 }
  0xd6   :  { %v760_v34 = vadd.f32 -1.0, %v821_v31  ;;  %v445_v35 = vpop.f32.mrf.mxu2  ;;  %v389_v41 = vpop.f32.mrf.mxu0 }
  0xd7   :  { %v474_v36 = vpop.f32.mrf.mxu3  ;;  %555 = vst.msk [vmem:[%s1069_s2 + $0xc] sm:$0xf] %vm551_vm1, %v546_v32  ;;  %822 = vpow2.f32 %v497_v33  ;;  %v446_v37 = vadd.f32 %v445_v35, %v417_v30  ;;  %v418_v42 = vpop.f32.mrf.mxu1 }
  0xd8   :  { %v515_v38 = vmul.f32 1.6732632, %v760_v34  ;;  %v419_v48 = vadd.f32 %v418_v42, %v389_v41 }
  0xd9   :  { %v475_v39 = vadd.f32 %v474_v36, %v446_v37 }
  0xda   :  { %v531_v40 = vsel %vm523_vm5, %v470_v11, %v515_v38 }
  0xdb   :  { %v539_v43 = vmul.f32 1.050701, %v531_v40  ;;  %v485_v44 = vmin.f32 %v475_v39, 0.0  ;;  %vm525_vm7 = vcmp.gt.f32.partialorder %v475_v39, 0.0 }
  0xdd   :  { %v823_v45 = vpop.eup %822  ;;  %v547_v46 = vpack.c.bf16 %v539_v43, %v539_v43  ;;  %v499_v47 = vmul.f32 1.442695, %v485_v44 }
  0xde   :  { %v761_v49 = vadd.f32 -1.0, %v823_v45  ;;  %v447_v50 = vpop.f32.mrf.mxu2 }
  0xdf   :  { %556 = vst.msk [vmem:[%s1069_s2 + $0x10] sm:$0xf] %vm551_vm1, %v547_v46  ;;  %824 = vpow2.f32 %v499_v47  ;;  %v448_v51 = vadd.f32 %v447_v50, %v419_v48  ;;  %v476_v53 = vpop.f32.mrf.mxu3 }
  0xe0   :  { %v516_v52 = vmul.f32 1.6732632, %v761_v49 }
  0xe1   :  { %v477_v54 = vadd.f32 %v476_v53, %v448_v51 }
  0xe2   :  { %v532_v55 = vsel %vm524_vm6, %v472_v26, %v516_v52 }
  0xe3   :  { %v540_v56 = vmul.f32 1.050701, %v532_v55  ;;  %v486_v57 = vmin.f32 %v477_v54, 0.0  ;;  %vm526_vm8 = vcmp.gt.f32.partialorder %v477_v54, 0.0 }
  0xe5   :  { %v825_v58 = vpop.eup %824  ;;  %v548_v59 = vpack.c.bf16 %v540_v56, %v540_v56  ;;  %v501_v60 = vmul.f32 1.442695, %v486_v57 }
  0xe6   :  { %v762_v61 = vadd.f32 -1.0, %v825_v58 }
  0xe7   :  { %557 = vst.msk [vmem:[%s1069_s2 + $0x14] sm:$0xf] %vm551_vm1, %v548_v59  ;;  %826 = vpow2.f32 %v501_v60 }
  0xe8   :  { %v517_v62 = vmul.f32 1.6732632, %v762_v61 }
  0xea   :  { %v533_v63 = vsel %vm525_vm7, %v475_v39, %v517_v62 }
  0xeb   :  { %v541_v0 = vmul.f32 1.050701, %v533_v63 }
  0xed   :  { %v827_v1 = vpop.eup %826  ;;  %v549_v2 = vpack.c.bf16 %v541_v0, %v541_v0 }
  0xee   :  { %v763_v3 = vadd.f32 -1.0, %v827_v1 }
  0xef   :  { %558 = vst.msk [vmem:[%s1069_s2 + $0x18] sm:$0xf] %vm551_vm1, %v549_v2 }
  0xf0   :  { %v518_v4 = vmul.f32 1.6732632, %v763_v3 }
  0xf2   :  { %v534_v5 = vsel %vm526_vm8, %v477_v54, %v518_v4 }
  0xf3   :  { %v542_v6 = vmul.f32 1.050701, %v534_v5 }
  0xf5   :  { %v550_v7 = vpack.c.bf16 %v542_v6, %v542_v6 }
  0xf7   :  { %559 = vst.msk [vmem:[%s1069_s2 + $0x1c] sm:$0xf] %vm551_vm1, %v550_v7 }

</bundles_post_ra>
